<compile_context>
chip_gen: v5e
topology: v5e:2x2
jax: 0.10.0
libtpu: 0.0.40
codegen_flags: <defaults>
</compile_context>

<pallas_src>
import functools
import math

import jax
import jax.numpy as jnp
from jax.experimental import pallas as pl
from jax.experimental.pallas import tpu as pltpu

BN_EPS = 1e-5
MATMUL_DTYPE = jnp.bfloat16   # matmul operand / intermediate activation dtype


def _round_up(x, m):
    return (x + m - 1) // m * m


def _pick_tn(coutp):
    """Cout tile: as wide as possible (<=512) so the j-grid collapses when it can."""
    for t in (512, 256, 128):
        if coutp % t == 0:
            return t
    return coutp


# ----------------------------------------------------------------------------
# Fused 3x3 conv + (folded) BN + ReLU Pallas kernel
# ----------------------------------------------------------------------------
# Input layout trick: let xp be the zero-padded plane of one batch element with
# shape (H+3, W+2, Cin) (1 pad row on top, 2 at the bottom, 1 pad col each side),
# flattened to (P, Cin) with P = (H+3)*(W+2).  If output positions are flattened
# with the *padded* stride, q = h*(W+2) + w, then the input needed by tap (ky,kx)
# for output q is simply row q + ky*(W+2) + kx of the flattened plane.  So every
# tap is a contiguous, statically-offset row window of one VMEM block, and the
# whole conv is 9 MXU matmuls accumulated in f32 — no im2col in HBM at all.
# Columns w in {W, W+1} of the flattened output are garbage and are sliced away
# by the wrapper (compute overhead factor (W+2)/W).
def _conv3x3_kernel(x_ref, w_ref, o_ref, *, W, apply_relu):
    # x_ref: (1, P, CinP)   flattened padded plane (bf16)
    # w_ref: (9, CinP, tn)  per-tap weights, BN scale folded in (bf16)
    # o_ref: (1, Mq, tn)    Mq = H*(W+2)
    Mq = o_ref.shape[1]
    tn = o_ref.shape[2]
    x = x_ref[0]                                   # (P, CinP)
    acc = jnp.zeros((Mq, tn), jnp.float32)
    for ky in range(3):
        for kx in range(3):
            off = ky * (W + 2) + kx                # static row shift in flattened plane
            xt = x[off:off + Mq, :]                # (Mq, CinP) — static slice, stays in VMEM
            acc = acc + jnp.dot(xt, w_ref[3 * ky + kx],
                                preferred_element_type=jnp.float32)
    if apply_relu:
        acc = jnp.maximum(acc, 0.0)
    o_ref[0] = acc.astype(o_ref.dtype)


def conv3x3_bn_relu(x, w_prep, out_dtype):
    """x: NHWC activation. w_prep: (9, CinP, CoutP) bf16, BN folded. Returns NHWC."""
    N, H, W, Cin = x.shape
    _, CinP, CoutP = w_prep.shape
    assert CinP >= Cin
    x = x.astype(MATMUL_DTYPE)
    # Spatial halo pad (1 top, 2 bottom, 1 left/right) + optional channel pad to CinP.
    xp = jnp.pad(x, ((0, 0), (1, 2), (1, 1), (0, CinP - Cin)))
    P = (H + 3) * (W + 2)
    xf = xp.reshape(N, P, CinP)
    Mq = H * (W + 2)

    tn = _pick_tn(CoutP)
    grid = (N, CoutP // tn)
    kernel = functools.partial(_conv3x3_kernel, W=W, apply_relu=True)

    out = pl.pallas_call(
        kernel,
        out_shape=jax.ShapeDtypeStruct((N, Mq, CoutP), out_dtype),
        grid_spec=pltpu.PrefetchScalarGridSpec(
            num_scalar_prefetch=0,
            grid=grid,
            in_specs=[
                pl.BlockSpec((1, P, CinP), lambda n, j: (n, 0, 0)),
                pl.BlockSpec((9, CinP, tn), lambda n, j: (0, 0, j)),
            ],
            out_specs=pl.BlockSpec((1, Mq, tn), lambda n, j: (n, 0, j)),
        ),
        compiler_params=pltpu.CompilerParams(
            dimension_semantics=("parallel", "parallel")),
        cost_estimate=pl.CostEstimate(
            flops=2 * N * Mq * 9 * CinP * CoutP,
            transcendentals=0,
            bytes_accessed=(xf.size * xf.dtype.itemsize
                            + w_prep.size * w_prep.dtype.itemsize
                            + N * Mq * CoutP * jnp.dtype(out_dtype).itemsize)),
    )(xf, w_prep)

    # Drop the 2 garbage columns per row; keep padded Cout channels (zeros) so the next
    # conv stays lane-dense — they are sliced off once at the end of the module.
    return out.reshape(N, H, W + 2, CoutP)[:, :, :W, :]


# ----------------------------------------------------------------------------
# Down module: maxpool (trivial memory-bound glue, left to XLA) + DoubleConv
# ----------------------------------------------------------------------------
def maxpool2x2(x):
    N, H, W, C = x.shape
    return x.reshape(N, H // 2, 2, W // 2, 2, C).max(axis=(2, 4))


def down_forward(x_nchw, params, *, out_channels):
    x = jnp.transpose(x_nchw, (0, 2, 3, 1))                      # NCHW -> NHWC
    x = maxpool2x2(x)
    x = conv3x3_bn_relu(x, params["w1"], out_dtype=MATMUL_DTYPE)  # conv+BN+ReLU
    x = conv3x3_bn_relu(x, params["w2"], out_dtype=jnp.float32)   # conv+BN+ReLU
    # Dropout(0.2) is identity in eval mode.
    x = x[..., :out_channels]                                     # drop Cout padding
    return jnp.transpose(x, (0, 3, 1, 2))                         # NHWC -> NCHW


# ----------------------------------------------------------------------------
# One-time weight preparation (torch layout -> matmul layout, BN folded, bf16)
# ----------------------------------------------------------------------------
def prepare_conv3x3_weight(w_torch, cin_pad):
    """w_torch: (Cout, Cin, 3, 3) f32 -> (9, cin_pad, Cout_padded) MATMUL_DTYPE."""
    cout, cin = w_torch.shape[0], w_torch.shape[1]
    coutp = _round_up(cout, 128)
    bn_scale = 1.0 / math.sqrt(1.0 + BN_EPS)      # eval-mode BN: mean=0, var=1, gamma=1
    w = jnp.transpose(w_torch, (2, 3, 1, 0)).reshape(9, cin, cout) * bn_scale
    wfull = jnp.zeros((9, cin_pad, coutp), jnp.float32).at[:, :cin, :cout].set(w)
    return wfull.astype(MATMUL_DTYPE)


def prepare_down_params(w1_torch, w2_torch):
    cin1 = w1_torch.shape[1]
    cout1p = _round_up(w1_torch.shape[0], 128)
    return {
        "w1": prepare_conv3x3_weight(w1_torch, cin_pad=cin1),
        "w2": prepare_conv3x3_weight(w2_torch, cin_pad=cout1p),
    }


# ----------------------------------------------------------------------------
# Pure-JAX reference (same bf16 operands / BN fold) for a correctness check
# ----------------------------------------------------------------------------
def _conv3x3_bn_relu_ref(x, w_prep, out_dtype):
    N, H, W, Cin = x.shape
    _, CinP, CoutP = w_prep.shape
    x = x.astype(MATMUL_DTYPE)
    xp = jnp.pad(x, ((0, 0), (1, 1), (1, 1), (0, CinP - Cin)))
    acc = jnp.zeros((N, H, W, CoutP), jnp.float32)
    for ky in range(3):
        for kx in range(3):
            xt = xp[:, ky:ky + H, kx:kx + W, :]
            acc = acc + jnp.einsum("nhwc,cd->nhwd", xt, w_prep[3 * ky + kx],
                                   preferred_element_type=jnp.float32)
    return jnp.maximum(acc, 0.0).astype(out_dtype)


def down_forward_ref(x_nchw, params, *, out_channels):
    x = jnp.transpose(x_nchw, (0, 2, 3, 1))
    x = maxpool2x2(x)
    x = _conv3x3_bn_relu_ref(x, params["w1"], MATMUL_DTYPE)
    x = _conv3x3_bn_relu_ref(x, params["w2"], jnp.float32)
    return jnp.transpose(x[..., :out_channels], (0, 3, 1, 2))


# ----------------------------------------------------------------------------
# Parameter init (kaiming_normal_, fan_out, relu — conv biases are disabled)
# ----------------------------------------------------------------------------
def _kaiming_conv(key, cout, cin, kh, kw):
    fan_out = cout * kh * kw
    std = (2.0 / fan_out) ** 0.5
    return jax.random.normal(key, (cout, cin, kh, kw), jnp.float32) * std


if __name__ == "__main__":
    in_channels, out_channels = 32, 64
    N, H0, W0 = 2, 16, 16

    key = jax.random.PRNGKey(0)
    kw1, kw2, kx = jax.random.split(key, 3)
    w1 = _kaiming_conv(kw1, out_channels, in_channels, 3, 3)   # DoubleConv conv1 (bias=False)
    w2 = _kaiming_conv(kw2, out_channels, out_channels, 3, 3)  # DoubleConv conv2 (bias=False)
    params = prepare_down_params(w1, w2)                       # one-time layout/BN fold

    x = jax.random.normal(kx, (N, in_channels, H0, W0), jnp.float32)  # NCHW input

    fwd = jax.jit(functools.partial(down_forward, out_channels=out_channels))
    out = fwd(x, params)
    jax.block_until_ready(out)
    assert out.shape == (N, out_channels, H0 // 2, W0 // 2), out.shape

    ref = jax.jit(functools.partial(down_forward_ref, out_channels=out_channels))(x, params)
    jax.block_until_ready(ref)
    max_err = float(jnp.max(jnp.abs(out - ref)))
    assert max_err < 1e-2, f"max abs err vs reference: {max_err}"

    print("KERNEL_OK")
</pallas_src>

<mosaic_0001>
module attributes {stable_mosaic.version = 11 : i64} {
  func.func @_conv3x3_kernel(%arg0: i32, %arg1: i32, %arg2: memref<1x110x32xbf16, #tpu.memory_space<vmem>>, %arg3: memref<9x32x128xbf16, #tpu.memory_space<vmem>>, %arg4: memref<1x80x128xbf16, #tpu.memory_space<vmem>>) attributes {dimension_semantics = [#tpu.dimension_semantics<parallel>, #tpu.dimension_semantics<parallel>], iteration_bounds = array<i64: 2, 1>, scalar_prefetch = 0 : i64, scratch_operands = 0 : i64, tpu.core_type = #tpu.core_type<tc>, window_params = [{transform_indices = @transform_0, window_bounds = array<i64: 1, 110, 32>}, {transform_indices = @transform_1, window_bounds = array<i64: 9, 32, 128>}, {transform_indices = @transform_2, window_bounds = array<i64: 1, 80, 128>}]} {
    %c0 = arith.constant 0 : index
    %c0_0 = arith.constant 0 : index
    %c0_1 = arith.constant 0 : index
    %0 = vector.load %arg2[%c0, %c0_0, %c0_1] : memref<1x110x32xbf16, #tpu.memory_space<vmem>>, vector<1x110x32xbf16>
    %1 = vector.shape_cast %0 : vector<1x110x32xbf16> to vector<110x32xbf16>
    %cst = arith.constant 0.000000e+00 : f32
    %2 = vector.broadcast %cst : f32 to vector<80x128xf32>
    %3 = vector.extract_strided_slice %1 {offsets = [0, 0], sizes = [80, 32], strides = [1, 1]} : vector<110x32xbf16> to vector<80x32xbf16>
    %c0_2 = arith.constant 0 : index
    %c0_3 = arith.constant 0 : index
    %c0_4 = arith.constant 0 : index
    %4 = vector.load %arg3[%c0_2, %c0_3, %c0_4] : memref<9x32x128xbf16, #tpu.memory_space<vmem>>, vector<1x32x128xbf16>
    %5 = vector.shape_cast %4 : vector<1x32x128xbf16> to vector<32x128xbf16>
    %cst_5 = arith.constant dense<0.000000e+00> : vector<80x128xf32>
    %6 = tpu.matmul %3, %5, %cst_5 {dimension_numbers = #tpu.dot_dimension_numbers<[1], [0], [0], [1], [0, 0, 1, 1], [], []>} : vector<80x32xbf16>, vector<32x128xbf16>, vector<80x128xf32> -> vector<80x128xf32>
    %7 = arith.addf %2, %6 : vector<80x128xf32>
    %8 = vector.extract_strided_slice %1 {offsets = [1, 0], sizes = [80, 32], strides = [1, 1]} : vector<110x32xbf16> to vector<80x32xbf16>
    %c1 = arith.constant 1 : index
    %c0_6 = arith.constant 0 : index
    %c0_7 = arith.constant 0 : index
    %9 = vector.load %arg3[%c1, %c0_6, %c0_7] : memref<9x32x128xbf16, #tpu.memory_space<vmem>>, vector<1x32x128xbf16>
    %10 = vector.shape_cast %9 : vector<1x32x128xbf16> to vector<32x128xbf16>
    %cst_8 = arith.constant dense<0.000000e+00> : vector<80x128xf32>
    %11 = tpu.matmul %8, %10, %cst_8 {dimension_numbers = #tpu.dot_dimension_numbers<[1], [0], [0], [1], [0, 0, 1, 1], [], []>} : vector<80x32xbf16>, vector<32x128xbf16>, vector<80x128xf32> -> vector<80x128xf32>
    %12 = arith.addf %7, %11 : vector<80x128xf32>
    %13 = vector.extract_strided_slice %1 {offsets = [2, 0], sizes = [80, 32], strides = [1, 1]} : vector<110x32xbf16> to vector<80x32xbf16>
    %c2 = arith.constant 2 : index
    %c0_9 = arith.constant 0 : index
    %c0_10 = arith.constant 0 : index
    %14 = vector.load %arg3[%c2, %c0_9, %c0_10] : memref<9x32x128xbf16, #tpu.memory_space<vmem>>, vector<1x32x128xbf16>
    %15 = vector.shape_cast %14 : vector<1x32x128xbf16> to vector<32x128xbf16>
    %cst_11 = arith.constant dense<0.000000e+00> : vector<80x128xf32>
    %16 = tpu.matmul %13, %15, %cst_11 {dimension_numbers = #tpu.dot_dimension_numbers<[1], [0], [0], [1], [0, 0, 1, 1], [], []>} : vector<80x32xbf16>, vector<32x128xbf16>, vector<80x128xf32> -> vector<80x128xf32>
    %17 = arith.addf %12, %16 : vector<80x128xf32>
    %18 = vector.extract_strided_slice %1 {offsets = [10, 0], sizes = [80, 32], strides = [1, 1]} : vector<110x32xbf16> to vector<80x32xbf16>
    %c3 = arith.constant 3 : index
    %c0_12 = arith.constant 0 : index
    %c0_13 = arith.constant 0 : index
    %19 = vector.load %arg3[%c3, %c0_12, %c0_13] : memref<9x32x128xbf16, #tpu.memory_space<vmem>>, vector<1x32x128xbf16>
    %20 = vector.shape_cast %19 : vector<1x32x128xbf16> to vector<32x128xbf16>
    %cst_14 = arith.constant dense<0.000000e+00> : vector<80x128xf32>
    %21 = tpu.matmul %18, %20, %cst_14 {dimension_numbers = #tpu.dot_dimension_numbers<[1], [0], [0], [1], [0, 0, 1, 1], [], []>} : vector<80x32xbf16>, vector<32x128xbf16>, vector<80x128xf32> -> vector<80x128xf32>
    %22 = arith.addf %17, %21 : vector<80x128xf32>
    %23 = vector.extract_strided_slice %1 {offsets = [11, 0], sizes = [80, 32], strides = [1, 1]} : vector<110x32xbf16> to vector<80x32xbf16>
    %c4 = arith.constant 4 : index
    %c0_15 = arith.constant 0 : index
    %c0_16 = arith.constant 0 : index
    %24 = vector.load %arg3[%c4, %c0_15, %c0_16] : memref<9x32x128xbf16, #tpu.memory_space<vmem>>, vector<1x32x128xbf16>
    %25 = vector.shape_cast %24 : vector<1x32x128xbf16> to vector<32x128xbf16>
    %cst_17 = arith.constant dense<0.000000e+00> : vector<80x128xf32>
    %26 = tpu.matmul %23, %25, %cst_17 {dimension_numbers = #tpu.dot_dimension_numbers<[1], [0], [0], [1], [0, 0, 1, 1], [], []>} : vector<80x32xbf16>, vector<32x128xbf16>, vector<80x128xf32> -> vector<80x128xf32>
    %27 = arith.addf %22, %26 : vector<80x128xf32>
    %28 = vector.extract_strided_slice %1 {offsets = [12, 0], sizes = [80, 32], strides = [1, 1]} : vector<110x32xbf16> to vector<80x32xbf16>
    %c5 = arith.constant 5 : index
    %c0_18 = arith.constant 0 : index
    %c0_19 = arith.constant 0 : index
    %29 = vector.load %arg3[%c5, %c0_18, %c0_19] : memref<9x32x128xbf16, #tpu.memory_space<vmem>>, vector<1x32x128xbf16>
    %30 = vector.shape_cast %29 : vector<1x32x128xbf16> to vector<32x128xbf16>
    %cst_20 = arith.constant dense<0.000000e+00> : vector<80x128xf32>
    %31 = tpu.matmul %28, %30, %cst_20 {dimension_numbers = #tpu.dot_dimension_numbers<[1], [0], [0], [1], [0, 0, 1, 1], [], []>} : vector<80x32xbf16>, vector<32x128xbf16>, vector<80x128xf32> -> vector<80x128xf32>
    %32 = arith.addf %27, %31 : vector<80x128xf32>
    %33 = vector.extract_strided_slice %1 {offsets = [20, 0], sizes = [80, 32], strides = [1, 1]} : vector<110x32xbf16> to vector<80x32xbf16>
    %c6 = arith.constant 6 : index
    %c0_21 = arith.constant 0 : index
    %c0_22 = arith.constant 0 : index
    %34 = vector.load %arg3[%c6, %c0_21, %c0_22] : memref<9x32x128xbf16, #tpu.memory_space<vmem>>, vector<1x32x128xbf16>
    %35 = vector.shape_cast %34 : vector<1x32x128xbf16> to vector<32x128xbf16>
    %cst_23 = arith.constant dense<0.000000e+00> : vector<80x128xf32>
    %36 = tpu.matmul %33, %35, %cst_23 {dimension_numbers = #tpu.dot_dimension_numbers<[1], [0], [0], [1], [0, 0, 1, 1], [], []>} : vector<80x32xbf16>, vector<32x128xbf16>, vector<80x128xf32> -> vector<80x128xf32>
    %37 = arith.addf %32, %36 : vector<80x128xf32>
    %38 = vector.extract_strided_slice %1 {offsets = [21, 0], sizes = [80, 32], strides = [1, 1]} : vector<110x32xbf16> to vector<80x32xbf16>
    %c7 = arith.constant 7 : index
    %c0_24 = arith.constant 0 : index
    %c0_25 = arith.constant 0 : index
    %39 = vector.load %arg3[%c7, %c0_24, %c0_25] : memref<9x32x128xbf16, #tpu.memory_space<vmem>>, vector<1x32x128xbf16>
    %40 = vector.shape_cast %39 : vector<1x32x128xbf16> to vector<32x128xbf16>
    %cst_26 = arith.constant dense<0.000000e+00> : vector<80x128xf32>
    %41 = tpu.matmul %38, %40, %cst_26 {dimension_numbers = #tpu.dot_dimension_numbers<[1], [0], [0], [1], [0, 0, 1, 1], [], []>} : vector<80x32xbf16>, vector<32x128xbf16>, vector<80x128xf32> -> vector<80x128xf32>
    %42 = arith.addf %37, %41 : vector<80x128xf32>
    %43 = vector.extract_strided_slice %1 {offsets = [22, 0], sizes = [80, 32], strides = [1, 1]} : vector<110x32xbf16> to vector<80x32xbf16>
    %c8 = arith.constant 8 : index
    %c0_27 = arith.constant 0 : index
    %c0_28 = arith.constant 0 : index
    %44 = vector.load %arg3[%c8, %c0_27, %c0_28] : memref<9x32x128xbf16, #tpu.memory_space<vmem>>, vector<1x32x128xbf16>
    %45 = vector.shape_cast %44 : vector<1x32x128xbf16> to vector<32x128xbf16>
    %cst_29 = arith.constant dense<0.000000e+00> : vector<80x128xf32>
    %46 = tpu.matmul %43, %45, %cst_29 {dimension_numbers = #tpu.dot_dimension_numbers<[1], [0], [0], [1], [0, 0, 1, 1], [], []>} : vector<80x32xbf16>, vector<32x128xbf16>, vector<80x128xf32> -> vector<80x128xf32>
    %47 = arith.addf %42, %46 : vector<80x128xf32>
    %cst_30 = arith.constant 0.000000e+00 : f32
    %48 = vector.broadcast %cst_30 : f32 to vector<80x128xf32>
    %49 = arith.maximumf %47, %48 : vector<80x128xf32>
    %50 = arith.truncf %49 : vector<80x128xf32> to vector<80x128xbf16>
    %c0_31 = arith.constant 0 : index
    %c0_32 = arith.constant 0 : index
    %c0_33 = arith.constant 0 : index
    %51 = vector.load %arg4[%c0_31, %c0_32, %c0_33] : memref<1x80x128xbf16, #tpu.memory_space<vmem>>, vector<1x80x128xbf16>
    %52 = vector.shape_cast %51 : vector<1x80x128xbf16> to vector<80x128xbf16>
    %53 = vector.shape_cast %50 : vector<80x128xbf16> to vector<1x80x128xbf16>
    tpu.vector_store %arg4[%c0_31, %c0_32, %c0_33], %53 {strides = array<i32>} : memref<1x80x128xbf16, #tpu.memory_space<vmem>>, vector<1x80x128xbf16>,
    return
  }
  func.func @transform_0(%arg0: i32, %arg1: i32) -> (i32, i32, i32) {
    %c0_i32 = arith.constant 0 : i32
    %c0_i32_0 = arith.constant 0 : i32
    %c0_i32_1 = arith.constant 0 : i32
    return %arg0, %c0_i32, %c0_i32_0 : i32, i32, i32
  }
  func.func @transform_1(%arg0: i32, %arg1: i32) -> (i32, i32, i32) {
    %c0_i32 = arith.constant 0 : i32
    %c0_i32_0 = arith.constant 0 : i32
    %c0_i32_1 = arith.constant 0 : i32
    return %c0_i32, %c0_i32_0, %arg1 : i32, i32, i32
  }
  func.func @transform_2(%arg0: i32, %arg1: i32) -> (i32, i32, i32) {
    %c0_i32 = arith.constant 0 : i32
    %c0_i32_0 = arith.constant 0 : i32
    return %arg0, %c0_i32, %arg1 : i32, i32, i32
  }
}

module attributes {stable_mosaic.version = 11 : i64} {
  func.func @_conv3x3_kernel(%arg0: i32, %arg1: i32, %arg2: memref<1x110x128xbf16, #tpu.memory_space<vmem>>, %arg3: memref<9x128x128xbf16, #tpu.memory_space<vmem>>, %arg4: memref<1x80x128xf32, #tpu.memory_space<vmem>>) attributes {dimension_semantics = [#tpu.dimension_semantics<parallel>, #tpu.dimension_semantics<parallel>], iteration_bounds = array<i64: 2, 1>, scalar_prefetch = 0 : i64, scratch_operands = 0 : i64, tpu.core_type = #tpu.core_type<tc>, window_params = [{transform_indices = @transform_0, window_bounds = array<i64: 1, 110, 128>}, {transform_indices = @transform_1, window_bounds = array<i64: 9, 128, 128>}, {transform_indices = @transform_2, window_bounds = array<i64: 1, 80, 128>}]} {
    %c0 = arith.constant 0 : index
    %c0_0 = arith.constant 0 : index
    %c0_1 = arith.constant 0 : index
    %0 = vector.load %arg2[%c0, %c0_0, %c0_1] : memref<1x110x128xbf16, #tpu.memory_space<vmem>>, vector<1x110x128xbf16>
    %1 = vector.shape_cast %0 : vector<1x110x128xbf16> to vector<110x128xbf16>
    %cst = arith.constant 0.000000e+00 : f32
    %2 = vector.broadcast %cst : f32 to vector<80x128xf32>
    %3 = vector.extract_strided_slice %1 {offsets = [0, 0], sizes = [80, 128], strides = [1, 1]} : vector<110x128xbf16> to vector<80x128xbf16>
    %c0_2 = arith.constant 0 : index
    %c0_3 = arith.constant 0 : index
    %c0_4 = arith.constant 0 : index
    %4 = vector.load %arg3[%c0_2, %c0_3, %c0_4] : memref<9x128x128xbf16, #tpu.memory_space<vmem>>, vector<1x128x128xbf16>
    %5 = vector.shape_cast %4 : vector<1x128x128xbf16> to vector<128x128xbf16>
    %cst_5 = arith.constant dense<0.000000e+00> : vector<80x128xf32>
    %6 = tpu.matmul %3, %5, %cst_5 {dimension_numbers = #tpu.dot_dimension_numbers<[1], [0], [0], [1], [0, 0, 1, 1], [], []>} : vector<80x128xbf16>, vector<128x128xbf16>, vector<80x128xf32> -> vector<80x128xf32>
    %7 = arith.addf %2, %6 : vector<80x128xf32>
    %8 = vector.extract_strided_slice %1 {offsets = [1, 0], sizes = [80, 128], strides = [1, 1]} : vector<110x128xbf16> to vector<80x128xbf16>
    %c1 = arith.constant 1 : index
    %c0_6 = arith.constant 0 : index
    %c0_7 = arith.constant 0 : index
    %9 = vector.load %arg3[%c1, %c0_6, %c0_7] : memref<9x128x128xbf16, #tpu.memory_space<vmem>>, vector<1x128x128xbf16>
    %10 = vector.shape_cast %9 : vector<1x128x128xbf16> to vector<128x128xbf16>
    %cst_8 = arith.constant dense<0.000000e+00> : vector<80x128xf32>
    %11 = tpu.matmul %8, %10, %cst_8 {dimension_numbers = #tpu.dot_dimension_numbers<[1], [0], [0], [1], [0, 0, 1, 1], [], []>} : vector<80x128xbf16>, vector<128x128xbf16>, vector<80x128xf32> -> vector<80x128xf32>
    %12 = arith.addf %7, %11 : vector<80x128xf32>
    %13 = vector.extract_strided_slice %1 {offsets = [2, 0], sizes = [80, 128], strides = [1, 1]} : vector<110x128xbf16> to vector<80x128xbf16>
    %c2 = arith.constant 2 : index
    %c0_9 = arith.constant 0 : index
    %c0_10 = arith.constant 0 : index
    %14 = vector.load %arg3[%c2, %c0_9, %c0_10] : memref<9x128x128xbf16, #tpu.memory_space<vmem>>, vector<1x128x128xbf16>
    %15 = vector.shape_cast %14 : vector<1x128x128xbf16> to vector<128x128xbf16>
    %cst_11 = arith.constant dense<0.000000e+00> : vector<80x128xf32>
    %16 = tpu.matmul %13, %15, %cst_11 {dimension_numbers = #tpu.dot_dimension_numbers<[1], [0], [0], [1], [0, 0, 1, 1], [], []>} : vector<80x128xbf16>, vector<128x128xbf16>, vector<80x128xf32> -> vector<80x128xf32>
    %17 = arith.addf %12, %16 : vector<80x128xf32>
    %18 = vector.extract_strided_slice %1 {offsets = [10, 0], sizes = [80, 128], strides = [1, 1]} : vector<110x128xbf16> to vector<80x128xbf16>
    %c3 = arith.constant 3 : index
    %c0_12 = arith.constant 0 : index
    %c0_13 = arith.constant 0 : index
    %19 = vector.load %arg3[%c3, %c0_12, %c0_13] : memref<9x128x128xbf16, #tpu.memory_space<vmem>>, vector<1x128x128xbf16>
    %20 = vector.shape_cast %19 : vector<1x128x128xbf16> to vector<128x128xbf16>
    %cst_14 = arith.constant dense<0.000000e+00> : vector<80x128xf32>
    %21 = tpu.matmul %18, %20, %cst_14 {dimension_numbers = #tpu.dot_dimension_numbers<[1], [0], [0], [1], [0, 0, 1, 1], [], []>} : vector<80x128xbf16>, vector<128x128xbf16>, vector<80x128xf32> -> vector<80x128xf32>
    %22 = arith.addf %17, %21 : vector<80x128xf32>
    %23 = vector.extract_strided_slice %1 {offsets = [11, 0], sizes = [80, 128], strides = [1, 1]} : vector<110x128xbf16> to vector<80x128xbf16>
    %c4 = arith.constant 4 : index
    %c0_15 = arith.constant 0 : index
    %c0_16 = arith.constant 0 : index
    %24 = vector.load %arg3[%c4, %c0_15, %c0_16] : memref<9x128x128xbf16, #tpu.memory_space<vmem>>, vector<1x128x128xbf16>
    %25 = vector.shape_cast %24 : vector<1x128x128xbf16> to vector<128x128xbf16>
    %cst_17 = arith.constant dense<0.000000e+00> : vector<80x128xf32>
    %26 = tpu.matmul %23, %25, %cst_17 {dimension_numbers = #tpu.dot_dimension_numbers<[1], [0], [0], [1], [0, 0, 1, 1], [], []>} : vector<80x128xbf16>, vector<128x128xbf16>, vector<80x128xf32> -> vector<80x128xf32>
    %27 = arith.addf %22, %26 : vector<80x128xf32>
    %28 = vector.extract_strided_slice %1 {offsets = [12, 0], sizes = [80, 128], strides = [1, 1]} : vector<110x128xbf16> to vector<80x128xbf16>
    %c5 = arith.constant 5 : index
    %c0_18 = arith.constant 0 : index
    %c0_19 = arith.constant 0 : index
    %29 = vector.load %arg3[%c5, %c0_18, %c0_19] : memref<9x128x128xbf16, #tpu.memory_space<vmem>>, vector<1x128x128xbf16>
    %30 = vector.shape_cast %29 : vector<1x128x128xbf16> to vector<128x128xbf16>
    %cst_20 = arith.constant dense<0.000000e+00> : vector<80x128xf32>
    %31 = tpu.matmul %28, %30, %cst_20 {dimension_numbers = #tpu.dot_dimension_numbers<[1], [0], [0], [1], [0, 0, 1, 1], [], []>} : vector<80x128xbf16>, vector<128x128xbf16>, vector<80x128xf32> -> vector<80x128xf32>
    %32 = arith.addf %27, %31 : vector<80x128xf32>
    %33 = vector.extract_strided_slice %1 {offsets = [20, 0], sizes = [80, 128], strides = [1, 1]} : vector<110x128xbf16> to vector<80x128xbf16>
    %c6 = arith.constant 6 : index
    %c0_21 = arith.constant 0 : index
    %c0_22 = arith.constant 0 : index
    %34 = vector.load %arg3[%c6, %c0_21, %c0_22] : memref<9x128x128xbf16, #tpu.memory_space<vmem>>, vector<1x128x128xbf16>
    %35 = vector.shape_cast %34 : vector<1x128x128xbf16> to vector<128x128xbf16>
    %cst_23 = arith.constant dense<0.000000e+00> : vector<80x128xf32>
    %36 = tpu.matmul %33, %35, %cst_23 {dimension_numbers = #tpu.dot_dimension_numbers<[1], [0], [0], [1], [0, 0, 1, 1], [], []>} : vector<80x128xbf16>, vector<128x128xbf16>, vector<80x128xf32> -> vector<80x128xf32>
    %37 = arith.addf %32, %36 : vector<80x128xf32>
    %38 = vector.extract_strided_slice %1 {offsets = [21, 0], sizes = [80, 128], strides = [1, 1]} : vector<110x128xbf16> to vector<80x128xbf16>
    %c7 = arith.constant 7 : index
    %c0_24 = arith.constant 0 : index
    %c0_25 = arith.constant 0 : index
    %39 = vector.load %arg3[%c7, %c0_24, %c0_25] : memref<9x128x128xbf16, #tpu.memory_space<vmem>>, vector<1x128x128xbf16>
    %40 = vector.shape_cast %39 : vector<1x128x128xbf16> to vector<128x128xbf16>
    %cst_26 = arith.constant dense<0.000000e+00> : vector<80x128xf32>
    %41 = tpu.matmul %38, %40, %cst_26 {dimension_numbers = #tpu.dot_dimension_numbers<[1], [0], [0], [1], [0, 0, 1, 1], [], []>} : vector<80x128xbf16>, vector<128x128xbf16>, vector<80x128xf32> -> vector<80x128xf32>
    %42 = arith.addf %37, %41 : vector<80x128xf32>
    %43 = vector.extract_strided_slice %1 {offsets = [22, 0], sizes = [80, 128], strides = [1, 1]} : vector<110x128xbf16> to vector<80x128xbf16>
    %c8 = arith.constant 8 : index
    %c0_27 = arith.constant 0 : index
    %c0_28 = arith.constant 0 : index
    %44 = vector.load %arg3[%c8, %c0_27, %c0_28] : memref<9x128x128xbf16, #tpu.memory_space<vmem>>, vector<1x128x128xbf16>
    %45 = vector.shape_cast %44 : vector<1x128x128xbf16> to vector<128x128xbf16>
    %cst_29 = arith.constant dense<0.000000e+00> : vector<80x128xf32>
    %46 = tpu.matmul %43, %45, %cst_29 {dimension_numbers = #tpu.dot_dimension_numbers<[1], [0], [0], [1], [0, 0, 1, 1], [], []>} : vector<80x128xbf16>, vector<128x128xbf16>, vector<80x128xf32> -> vector<80x128xf32>
    %47 = arith.addf %42, %46 : vector<80x128xf32>
    %cst_30 = arith.constant 0.000000e+00 : f32
    %48 = vector.broadcast %cst_30 : f32 to vector<80x128xf32>
    %49 = arith.maximumf %47, %48 : vector<80x128xf32>
    %c0_31 = arith.constant 0 : index
    %c0_32 = arith.constant 0 : index
    %c0_33 = arith.constant 0 : index
    %50 = vector.load %arg4[%c0_31, %c0_32, %c0_33] : memref<1x80x128xf32, #tpu.memory_space<vmem>>, vector<1x80x128xf32>
    %51 = vector.shape_cast %50 : vector<1x80x128xf32> to vector<80x128xf32>
    %52 = vector.shape_cast %49 : vector<80x128xf32> to vector<1x80x128xf32>
    tpu.vector_store %arg4[%c0_31, %c0_32, %c0_33], %52 {strides = array<i32>} : memref<1x80x128xf32, #tpu.memory_space<vmem>>, vector<1x80x128xf32>,
    return
  }
  func.func @transform_0(%arg0: i32, %arg1: i32) -> (i32, i32, i32) {
    %c0_i32 = arith.constant 0 : i32
    %c0_i32_0 = arith.constant 0 : i32
    %c0_i32_1 = arith.constant 0 : i32
    return %arg0, %c0_i32, %c0_i32_0 : i32, i32, i32
  }
  func.func @transform_1(%arg0: i32, %arg1: i32) -> (i32, i32, i32) {
    %c0_i32 = arith.constant 0 : i32
    %c0_i32_0 = arith.constant 0 : i32
    %c0_i32_1 = arith.constant 0 : i32
    return %c0_i32, %c0_i32_0, %arg1 : i32, i32, i32
  }
  func.func @transform_2(%arg0: i32, %arg1: i32) -> (i32, i32, i32) {
    %c0_i32 = arith.constant 0 : i32
    %c0_i32_0 = arith.constant 0 : i32
    return %arg0, %c0_i32, %arg1 : i32, i32, i32
  }
}

</mosaic_0001>

<bundles_post_ra>
// kernel: down_forward.2
= control target key start
LH: loop header
LB: loop body
LE: loop exit
PB: predicated region body
PF: predicated region fallthrough
CT: control target
= control target key end

     0   :  { %s1542_s9 = smov 0   ;;  %s1544_s10 = smov 0   ;;  %s1904_s0 = inlined_call_operand.vmem [shape: bf16[2,110,32], index: 0, kind: input, shape index: {}]   ;;  %s1905_s1 = inlined_call_operand.vmem [shape: bf16[9,32,128], index: 1, kind: input, shape index: {}]   ;;  %s1906_s2 = inlined_call_operand.vmem [shape: bf16[2,80,128], index: 2, kind: output, shape index: {}]  }
   0x1   :  { %s1546_s11 = smov 0  }
   0x2 LB: > { %s24_s12 = sadd.s32 1, %s1521_s10  ;;  %p1213_p0 = scmp.ge.s32.totalorder %s1525_s11, 1  ;;  %s1525_s11 = sphi %s1546_s11, %s12_s11   ;;  %s1521_s10 = sphi %s1544_s10, %s1908_s10   ;;  %s1517_s9 = sphi %s1542_s9, %s1907_s9  }
   0x3   : > { %p26_p1 = scmp.ge.s32.totalorder %s24_s12, 2  ;;  %p135_p2 = scmp.lt.s32.totalorder %s1525_s11, 3 }
   0x5   : > { %s1910_s12 = smov (%p26_p1, %s24_s12), 0  ;;  %p136_p3 = pnand %p1213_p0, %p135_p2 }
   0x6   : > { %p164_p4 = scmp.lt.s32.totalorder (!%p136_p3), %s1517_s9, 1 }
   0x7   : > { %139 = sbr.rel (%p136_p3) target bundleno = 351 (0x15f), region = 28 }
   0xc   : > { %v1370_v0 = vld [vmem:[%s1905_s1 + $0x18] sm:$0xff]  ;;  %v1369_v1 = vld [vmem:[%s1905_s1 + $0x10] sm:$0xff]  ;;  %s1912_s9 = smov (!%p164_p4, %s1517_s9), 1  ;;  %v1372_v2 = vld [vmem:[%s1905_s1 + $0x28] sm:$0xff]  ;;  %vm232_vm0 = vsmask.f32 7424 }
   0xd   : > { %1471 = vmatpush.bf16.msra.mxu1 %v1370_v0  ;;  %1472 = vmatpush.bf16.msra.mxu2 %v1370_v0  ;;  %s1477_s19 = smul.u32 56, %s1912_s9  ;;  %v1368_v3 = vld [vmem:[%s1905_s1 + $0x8] sm:$0xff]  ;;  %v1374_v4 = vld [vmem:[%s1905_s1 + $0x38] sm:$0xff]  ;;  %v1367_v6 = vld [vmem:[%s1905_s1] sm:$0xff]  ;;  %vm289_vm1 = vcmask 261120   ;;  %vm400_vm2 = vcmask 1046528  }
   0xe   : > { %1473 = vmatpush.bf16.msra.mxu3 %v1370_v0  ;;  %311 = vmatpush.bf16.msra.mxu0 %v1370_v0  ;;  %v1376_v5 = vld [vmem:[%s1905_s1 + $0x48] sm:$0xff]  ;;  %v1371_v7 = vld [vmem:[%s1905_s1 + $0x20] sm:$0xff]  ;;  %v1373_v20 = vld [vmem:[%s1905_s1 + $0x30] sm:$0xff]  ;;  %vm583_vm3 = vsmask.f32 6400  ;;  %vm713_vm4 = vcmask 1045504  }
   0xf   : > { %s1584_s28 = scalar_lea.vmem %s1904_s0, %s1477_s19  ;;  %v1375_v21 = vld [vmem:[%s1905_s1 + $0x40] sm:$0xff]  ;;  %v1380_v39 = vld [vmem:[%s1905_s1 + $0x68] sm:$0xff]  ;;  %v1382_v40 = vld [vmem:[%s1905_s1 + $0x78] sm:$0xff]  ;;  %vm892_vm5 = vsmask.f32 5376  ;;  %vm1002_vm6 = vcmask 1044480  }
  0x10   : > { %v1593_v8 = vld [vmem:[%s1584_s28 + $0x8] sm:$0xff]   ;;  %v1596_v9 = vld [vmem:[%s1584_s28 + $0x10] sm:$0xff]   ;;  %v1599_v10 = vld [vmem:[%s1584_s28 + $0x18] sm:$0xff]  }
  0x11   : > { %1474 = vmatpush.bf16.msra.mxu1 %v1369_v1  ;;  %1475 = vmatpush.bf16.msra.mxu2 %v1369_v1  ;;  %v241_v11 = vshll.u32 %v1593_v8, 16  ;;  %v245_v12 = vshrl.u32 %v1593_v8, 16  ;;  %v249_v13 = vshll.u32 %v1596_v9, 16  ;;  %v253_v14 = vshrl.u32 %v1596_v9, 16  ;;  %v1606_v15 = vld [vmem:[%s1584_s28 + $0x20] sm:$0xff]   ;;  %v1609_v16 = vld [vmem:[%s1584_s28 + $0x28] sm:$0xff]  }
  0x12   : > { %1476 = vmatpush.bf16.msra.mxu3 %v1369_v1  ;;  %312 = vmatpush.bf16.msra.mxu0 %v1369_v1  ;;  %v257_v17 = vshll.u32 %v1599_v10, 16  ;;  %v1613_v18 = vunpack.c.l.b16 %v1609_v16  ;;  %v265_v19 = vshll.u32 %v1606_v15, 16  ;;  %v1627_v24 = vld [vmem:[%s1584_s28] sm:$0xff]   ;;  %v269_v30 = vshrl.u32 %v1606_v15, 16  ;;  %v1378_v41 = vld [vmem:[%s1905_s1 + $0x58] sm:$0xff]  ;;  %v1384_v44 = vld [vmem:[%s1905_s1 + $0x88] sm:$0xff] }
  0x13   : > { %v243_v22 = vrot.slane %v241_v11, 1  ;;  %v251_v23 = vrot.slane %v249_v13, 1  ;;  %v234_v32 = vshrl.u32 %v1627_v24, 16  ;;  %v236_v33 = vshll.u32 %v1627_v24, 16  ;;  %v1667_v46 = vld [vmem:[%s1584_s28 + $0x4] sm:$0xff]   ;;  %v1670_v47 = vld [vmem:[%s1584_s28 + $0xc] sm:$0xff]  }
  0x14   : > { %v259_v25 = vrot.slane %v257_v17, 1  ;;  %v1633_v26 = vpack.c.b16 %v1613_v18, %v1613_v18  ;;  %v267_v27 = vrot.slane %v265_v19, 1  ;;  %v261_v48 = vshrl.u32 %v1599_v10, 16  ;;  %v1690_v1 = vld [vmem:[%s1584_s28 + $0x14] sm:$0xff]  }
  0x15   : > { %445 = vmatpush.bf16.msrb.mxu2 %v1372_v2  ;;  %367 = vmatpush.bf16.msrb.mxu1 %v1368_v3  ;;  %v247_v28 = vor.u32 %v245_v12, %v243_v22  ;;  %v255_v29 = vor.u32 %v253_v14, %v251_v23  ;;  %v238_v38 = vrot.slane %v236_v33, 1  ;;  %v585_v49 = vshrl.u32 %v1667_v46, 16 }
  0x16   : > { %540 = vmatpush.bf16.msrb.mxu3 %v1374_v4  ;;  %670 = vmatpush.bf16.msrb.mxu0 %v1376_v5  ;;  %v273_v31 = vshll.u32 %v1633_v26, 16  ;;  %v271_v36 = vor.u32 %v269_v30, %v267_v27  ;;  %v588_v50 = vshll.u32 %v1667_v46, 16  ;;  %v593_v51 = vshrl.u32 %v1670_v47, 16 }
  0x17   : > { %v252_v34 = vsel %vm232_vm0, %v247_v28, %v251_v23  ;;  %v260_v35 = vsel %vm232_vm0, %v255_v29, %v259_v25  ;;  %v239_v43 = vor.u32 %v238_v38, %v234_v32  ;;  %v596_v52 = vshll.u32 %v1670_v47, 16  ;;  %v1377_v28 = vld [vmem:[%s1905_s1 + $0x50] sm:$0xff]  ;;  %v1715_v29 = vld [vmem:[%s1584_s28 + $0x1c] sm:$0xff]  }
  0x18   : > { %1229 = vmatmul.msk.bf16.vlgmr.msra.gmra.mxu1 %vm289_vm1, %v252_v34  ;;  %1230 = vmatmul.msk.bf16.vlgmr.msra.gmra.mxu2 %vm289_vm1, %v260_v35  ;;  %v275_v37 = vrot.slane %v273_v31, 1  ;;  %v263_v53 = vor.u32 %v261_v48, %v259_v25  ;;  %v587_v54 = vrot.slane %v585_v49, 1  ;;  %v590_v55 = vrot.slane %v588_v50, 2 }
  0x19   : > { %446 = vmatpush.bf16.msrb.mxu2 %v1371_v7  ;;  %368 = vmatpush.bf16.msrb.mxu1 %v1367_v6  ;;  %v244_v45 = vsel %vm232_vm0, %v239_v43, %v243_v22  ;;  %v595_v56 = vrot.slane %v593_v51, 1  ;;  %v598_v57 = vrot.slane %v596_v52, 2  ;;  %v496_v58 = vrot.slane %v1667_v46, 1 }
  0x1a   : > { %541 = vmatpush.bf16.msrb.mxu3 %v1373_v20  ;;  %671 = vmatpush.bf16.msrb.mxu0 %v1375_v21  ;;  %v276_v42 = vsel %vm232_vm0, %v271_v36, %v275_v37  ;;  %v497_v59 = vrot.slane %v1670_v47, 1  ;;  %v268_v60 = vsel %vm232_vm0, %v263_v53, %v267_v27  ;;  %v591_v61 = vor.u32 %v590_v55, %v587_v54  ;;  %v1381_v27 = vld [vmem:[%s1905_s1 + $0x70] sm:$0xff] }
  0x1b   : > { %1232 = vmatmul.msk.bf16.vlgmr.msra.gmra.mxu3 %vm289_vm1, %v276_v42  ;;  %1228 = vmatmul.msk.bf16.vlgmr.msra.gmra.mxu0 %vm289_vm1, %v244_v45  ;;  %v599_v62 = vor.u32 %v598_v57, %v595_v56  ;;  %v602_v2 = vshrl.u32 %v1690_v1, 16  ;;  %v605_v3 = vshll.u32 %v1690_v1, 16  ;;  %v401_v4 = vrot.slane %v1627_v24, 1 }
  0x1c   : > { %v498_v63 = vsel %vm400_vm2, %v496_v58, %v497_v59  ;;  %v402_v5 = vrot.slane %v1593_v8, 1  ;;  %v499_v20 = vrot.slane %v1690_v1, 1  ;;  %v611_v31 = vshrl.u32 %v1715_v29, 16 }
  0x1d   : > { %849 = vmatpush.bf16.msra.mxu2 %v1380_v39  ;;  %758 = vmatpush.bf16.msra.mxu1 %v1378_v41  ;;  %v600_v0 = vsel %vm583_vm3, %v591_v61, %v599_v62  ;;  %v604_v6 = vrot.slane %v602_v2, 1  ;;  %v607_v7 = vrot.slane %v605_v3, 2  ;;  %v614_v32 = vshll.u32 %v1715_v29, 16  ;;  %v1383_v41 = vld [vmem:[%s1905_s1 + $0x80] sm:$0xff] }
  0x1e   : > { %959 = vmatpush.bf16.msra.mxu3 %v1382_v40  ;;  %1047 = vmatpush.bf16.msra.mxu0 %v1384_v44  ;;  %v403_v21 = vsel %vm400_vm2, %v401_v4, %v402_v5  ;;  %v500_v23 = vsel %vm400_vm2, %v497_v59, %v499_v20  ;;  %v404_v33 = vrot.slane %v1596_v9, 1  ;;  %v613_v34 = vrot.slane %v611_v31, 1 }
  0x1f   : > { %v608_v22 = vor.u32 %v607_v7, %v604_v6  ;;  %v616_v35 = vrot.slane %v614_v32, 2  ;;  %v501_v36 = vrot.slane %v1715_v29, 1  ;;  %v1404_v39 = vunpack.c.h.b16 %v1606_v15 }
  0x20   : > { %v405_v37 = vsel %vm400_vm2, %v402_v5, %v404_v33  ;;  %v408_v43 = vrot.slane %v1606_v15, 1  ;;  %v410_v44 = vrot.slane %v1633_v26, 1  ;;  %v406_v52 = vrot.slane %v1599_v10, 1 }
  0x21   : > { %v609_v25 = vsel %vm583_vm3, %v599_v62, %v608_v22  ;;  %759 = vmatpush.bf16.msra.mxu1 %v1377_v28  ;;  %v617_v38 = vor.u32 %v616_v35, %v613_v34  ;;  %v502_v40 = vsel %vm400_vm2, %v499_v20, %v501_v36  ;;  %v1736_v45 = vpack.c.b16 %v1613_v18, %v1404_v39 }
  0x22   : > { %960 = vmatpush.bf16.msra.mxu3 %v1381_v27  ;;  %1048 = vmatpush.bf16.msra.mxu0 %v1383_v41  ;;  %v411_v49 = vsel %vm400_vm2, %v408_v43, %v410_v44  ;;  %v897_v55 = vrot.slane %v249_v13, 3  ;;  %v896_v26 = vrot.slane %v253_v14, 2  ;;  %v407_v56 = vsel %vm400_vm2, %v404_v33, %v406_v52 }
  0x23   : > { %v618_v42 = vsel %vm583_vm3, %v608_v22, %v617_v38  ;;  %v620_v50 = vshrl.u32 %v1736_v45, 16  ;;  %v623_v51 = vshll.u32 %v1736_v45, 16  ;;  %v503_v18 = vrot.slane %v1736_v45, 1 }
  0x24   : > { %v714_v57 = vrot.slane %v1667_v46, 2  ;;  %v715_v58 = vrot.slane %v1670_v47, 2  ;;  %v893_v59 = vrot.slane %v245_v12, 2  ;;  %v1408_v14 = vunpack.c.h.b16 %v1609_v16 }
  0x25   : > { %v622_v53 = vrot.slane %v620_v50, 1  ;;  %v625_v54 = vrot.slane %v623_v51, 2  ;;  %v504_v13 = vsel %vm400_vm2, %v501_v36, %v503_v18  ;;  %v894_v46 = vrot.slane %v241_v11, 3 }
  0x26   : > { %v716_v61 = vsel %vm713_vm4, %v714_v57, %v715_v58  ;;  %v898_v47 = vor.u32 %v897_v55, %v896_v26  ;;  %v409_v20 = vsel %vm400_vm2, %v406_v52, %v408_v43  ;;  %v900_v27 = vrot.slane %v261_v48, 2  ;;  %v194_v55 = vld [vmem:[%s1584_s28 + $0x30] sm:$0xf]  ;;  %s1478_s28 = smul.u32 40, %s1912_s9 }
  0x27   : > { %v895_v62 = vor.u32 %v894_v46, %v893_v59  ;;  %v901_v28 = vrot.slane %v257_v17, 3  ;;  %v805_v31 = vrot.slane %v1593_v8, 2  ;;  %v806_v32 = vrot.slane %v1596_v9, 2 }
  0x28   : > { %1231 = vmatmul.msk.bf16.gmra.mxu2 %vm289_vm1, %v268_v60  ;;  %1241 = vmatmul.msk.bf16.vlgmr.msrb.gmra.mxu1 %vm289_vm1, %v1627_v24  ;;  %v1379_v24 = vld [vmem:[%s1905_s1 + $0x60] sm:$0xff]  ;;  %v626_v60 = vor.u32 %v625_v54, %v622_v53  ;;  %v1006_v35 = vrot.slane %v1599_v10, 3  ;;  %v719_v17 = vrot.slane %v1715_v29, 2  ;;  %v912_v44 = vshll.u32 %v1609_v16, 16  ;;  %s1880_s4 = scalar_lea.vmem %s1906_s2, %s1478_s28 }
  0x29   : > { %850 = vmatpush.bf16.msra.mxu2 %v1379_v24  ;;  %v899_v2 = vsel %vm892_vm5, %v895_v62, %v898_v47  ;;  %v1004_v24 = vrot.slane %v1596_v9, 3  ;;  %v902_v33 = vor.u32 %v901_v28, %v900_v27  ;;  %v807_v34 = vsel %vm713_vm4, %v805_v31, %v806_v32 }
  0x2a   : > { %v627_v12 = vsel %vm583_vm3, %v617_v38, %v626_v60  ;;  %v914_v52 = vrot.slane %v912_v44, 3  ;;  %v721_v53 = vrot.slane %v1736_v45, 2  ;;  %v810_v54 = vrot.slane %v1606_v15, 2 }
  0x2b   : > { %1275 = vmatmul.msk.bf16.vlgmr.msrb.gmra.mxu3 %vm289_vm1, %v498_v63  ;;  %1292 = vmatmul.msk.bf16.vlgmr.msrb.gmra.mxu0 %vm289_vm1, %v600_v0  ;;  %v717_v63 = vrot.slane %v1690_v1, 2  ;;  %v1764_v0 = vpack.c.b16 %v1408_v14, %v1408_v14  ;;  %v903_v36 = vsel %vm892_vm5, %v898_v47, %v902_v33  ;;  %v1007_v48 = vsel %vm1002_vm6, %v1004_v24, %v1006_v35 }
  0x2c   : > { %v802_v57 = vunpack.c.l.b16 %v194_v55  ;;  %v722_v59 = vsel %vm713_vm4, %v719_v17, %v721_v53  ;;  %v1010_v14 = vrot.slane %v1609_v16, 3 }
  0x2d   : > { %v718_v3 = vsel %vm713_vm4, %v715_v58, %v717_v63  ;;  %v629_v4 = vshrl.u32 %v1764_v0, 16  ;;  %v632_v11 = vshll.u32 %v1764_v0, 16  ;;  %v505_v7 = vrot.slane %v1764_v0, 1 }
  0x2e   : > { %v804_v45 = vpack.c.b16 %v802_v57, %v802_v57 }
  0x2f   : > { %v631_v5 = vrot.slane %v629_v4, 1  ;;  %v634_v6 = vrot.slane %v632_v11, 2  ;;  %v506_v1 = vsel %vm400_vm2, %v503_v18, %v505_v7  ;;  %v812_v7 = vrot.slane %v1609_v16, 2 }
  0x30   : > { %v918_v62 = vshrl.u32 %v804_v45, 16  ;;  %v1012_v28 = vrot.slane %v804_v45, 3 }
  0x32   : > { %v920_v11 = vrot.slane %v918_v62, 2 }
  0x38   : > { %1242 = vmatmul.msk.bf16.gmra.mxu1 %vm289_vm1, %v1593_v8  ;;  %1258 = vmatmul.msk.bf16.vlgmr.msrb.gmra.mxu2 %vm289_vm1, %v403_v21  ;;  %v635_v21 = vor.u32 %v634_v6, %v631_v5  ;;  %v723_v6 = vrot.slane %v1764_v0, 2 }
  0x3a   : > { %v636_v22 = vsel %vm583_vm3, %v626_v60, %v635_v21 }
  0x3b   : > { %1276 = vmatmul.msk.bf16.gmra.mxu3 %vm289_vm1, %v500_v23  ;;  %1293 = vmatmul.msk.bf16.gmra.mxu0 %vm289_vm1, %v609_v25  ;;  %v1003_v23 = vrot.slane %v1593_v8, 3  ;;  %v904_v8 = vrot.slane %v269_v30, 2 }
  0x3d   : > { %v1005_v25 = vsel %vm1002_vm6, %v1003_v23, %v1004_v24  ;;  %v724_v23 = vsel %vm713_vm4, %v721_v53, %v723_v6  ;;  %v813_v24 = vsel %vm713_vm4, %v810_v54, %v812_v7 }
  0x48   : > { %1243 = vmatmul.msk.bf16.gmra.mxu1 %vm289_vm1, %v1596_v9  ;;  %1259 = vmatmul.msk.bf16.gmra.mxu2 %vm289_vm1, %v405_v37  ;;  %v905_v9 = vrot.slane %v265_v19, 3  ;;  %v808_v37 = vrot.slane %v1599_v10, 2 }
  0x4a   : > { %v906_v38 = vor.u32 %v905_v9, %v904_v8  ;;  %v809_v41 = vsel %vm713_vm4, %v806_v32, %v808_v37  ;;  %v811_v60 = vsel %vm713_vm4, %v808_v37, %v810_v54  ;;  %v814_v9 = vrot.slane %v804_v45, 2 }
  0x4b   : > { %1277 = vmatmul.msk.bf16.gmra.mxu3 %vm289_vm1, %v502_v40  ;;  %1294 = vmatmul.msk.bf16.gmra.mxu0 %vm289_vm1, %v618_v42  ;;  %v720_v40 = vsel %vm713_vm4, %v717_v63, %v719_v17  ;;  %v1008_v42 = vrot.slane %v1606_v15, 3  ;;  %v921_v63 = vshll.u32 %v804_v45, 16 }
  0x4c   : > { %v907_v30 = vsel %vm892_vm5, %v902_v33, %v906_v38 }
  0x4d   : > { %v1009_v29 = vsel %vm1002_vm6, %v1006_v35, %v1008_v42  ;;  %v1011_v47 = vsel %vm1002_vm6, %v1008_v42, %v1010_v14  ;;  %v923_v5 = vrot.slane %v921_v63, 3 }
  0x58   : > { %1244 = vmatmul.msk.bf16.gmra.mxu1 %vm289_vm1, %v1599_v10  ;;  %1260 = vmatmul.msk.bf16.gmra.mxu2 %vm289_vm1, %v407_v56  ;;  %v909_v10 = vshrl.u32 %v1609_v16, 16  ;;  %v1013_v16 = vsel %vm1002_vm6, %v1010_v14, %v1012_v28 }
  0x5a   : > { %v911_v51 = vrot.slane %v909_v10, 2 }
  0x5b   : > { %1278 = vmatmul.msk.bf16.gmra.mxu3 %vm289_vm1, %v504_v13  ;;  %1295 = vmatmul.msk.bf16.gmra.mxu0 %vm289_vm1, %v627_v12 }
  0x5c   : > { %v915_v56 = vor.u32 %v914_v52, %v911_v51 }
  0x68   : > { %1245 = vmatmul.msk.bf16.gmra.mxu1 %vm289_vm1, %v1606_v15  ;;  %1261 = vmatmul.msk.bf16.gmra.mxu2 %vm289_vm1, %v409_v20  ;;  %v916_v15 = vsel %vm892_vm5, %v906_v38, %v915_v56 }
  0x6b   : > { %1279 = vmatmul.msk.bf16.gmra.mxu3 %vm289_vm1, %v506_v1  ;;  %1296 = vmatmul.msk.bf16.gmra.mxu0 %vm289_vm1, %v636_v22  ;;  %v924_v1 = vor.u32 %v923_v5, %v920_v11 }
  0x6d   : > { %v925_v31 = vsel %vm892_vm5, %v915_v56, %v924_v1 }
  0x78   : > { %1262 = vmatmul.msk.bf16.gmra.mxu2 %vm289_vm1, %v411_v49  ;;  %1309 = vmatmul.msk.bf16.vlgmr.msra.gmra.mxu1 %vm289_vm1, %v716_v61 }
  0x7b   : > { %1343 = vmatmul.msk.bf16.vlgmr.msra.gmra.mxu3 %vm289_vm1, %v899_v2  ;;  %1360 = vmatmul.msk.bf16.vlgmr.msra.gmra.mxu0 %vm289_vm1, %v1005_v25 }
  0x88   : > { %1310 = vmatmul.msk.bf16.gmra.mxu1 %vm289_vm1, %v718_v3  ;;  %1326 = vmatmul.msk.bf16.vlgmr.msra.gmra.mxu2 %vm289_vm1, %v807_v34 }
  0x8b   : > { %1344 = vmatmul.msk.bf16.gmra.mxu3 %vm289_vm1, %v903_v36  ;;  %1361 = vmatmul.msk.bf16.gmra.mxu0 %vm289_vm1, %v1007_v48 }
  0x95   : > { %v319_v39 = vpop.f32.mrf.mxu1 }
  0x98   : > { %1311 = vmatmul.msk.bf16.gmra.mxu1 %vm289_vm1, %v720_v40  ;;  %1327 = vmatmul.msk.bf16.gmra.mxu2 %vm289_vm1, %v809_v41  ;;  %v314_v19 = vpop.f32.mrf.mxu0  ;;  %v815_v40 = vsel %vm713_vm4, %v812_v7, %v814_v9 }
  0x9b   : > { %v1814_v43 = vpop.f32.mrf.mxu2  ;;  %1345 = vmatmul.msk.bf16.gmra.mxu3 %vm289_vm1, %v907_v30  ;;  %1362 = vmatmul.msk.bf16.gmra.mxu0 %vm289_vm1, %v1009_v29 }
  0x9d   : > { %v321_v49 = vpop.f32.mrf.mxu1 }
  0x9e   : > { %v1820_v50 = vpop.f32.mrf.mxu3 }
  0xa0   : > { %v316_v26 = vpop.f32.mrf.mxu0 }
  0xa3   : > { %v1825_v18 = vpop.f32.mrf.mxu2 }
  0xa5   : > { %v370_v58 = vpop.f32.mrf.mxu1 }
  0xa6   : > { %v371_v61 = vadd.f32 %v370_v58, %v314_v19  ;;  %v1829_v13 = vpop.f32.mrf.mxu3 }
  0xa8   : > { %1312 = vmatmul.msk.bf16.gmra.mxu1 %vm289_vm1, %v722_v59  ;;  %1328 = vmatmul.msk.bf16.gmra.mxu2 %vm289_vm1, %v811_v60  ;;  %v673_v46 = vpop.f32.mrf.mxu0 }
  0xab   : > { %v329_v12 = vpop.f32.mrf.mxu2  ;;  %1346 = vmatmul.msk.bf16.gmra.mxu3 %vm289_vm1, %v916_v15  ;;  %1363 = vmatmul.msk.bf16.gmra.mxu0 %vm289_vm1, %v1011_v47 }
  0xad   : > { %v372_v2 = vpop.f32.mrf.mxu1 }
  0xae   : > { %v373_v3 = vadd.f32 %v372_v2, %v316_v26  ;;  %v543_v4 = vpop.f32.mrf.mxu3 }
  0xb0   : > { %v675_v20 = vpop.f32.mrf.mxu0 }
  0xb3   : > { %v331_v21 = vpop.f32.mrf.mxu2 }
  0xb5   : > { %v375_v22 = vpop.f32.mrf.mxu1 }
  0xb6   : > { %v376_v25 = vadd.f32 %v375_v22, %v319_v39  ;;  %v545_v27 = vpop.f32.mrf.mxu3 }
  0xb8   : > { %1313 = vmatmul.msk.bf16.gmra.mxu1 %vm289_vm1, %v724_v23  ;;  %1329 = vmatmul.msk.bf16.gmra.mxu2 %vm289_vm1, %v813_v24  ;;  %v678_v0 = vpop.f32.mrf.mxu0 }
  0xbb   : > { %v448_v32 = vpop.f32.mrf.mxu2  ;;  %1347 = vmatmul.msk.bf16.gmra.mxu3 %vm289_vm1, %v925_v31  ;;  %1364 = vmatmul.msk.bf16.gmra.mxu0 %vm289_vm1, %v1013_v16 }
  0xbc   : > { %v473_v33 = vadd.f32 %v448_v32, %v371_v61 }
  0xbd   : > { %v377_v34 = vpop.f32.mrf.mxu1 }
  0xbe   : > { %v568_v35 = vadd.f32 %v543_v4, %v473_v33  ;;  %v378_v36 = vadd.f32 %v377_v34, %v321_v49  ;;  %v548_v48 = vpop.f32.mrf.mxu3 }
  0xc0   : > { %v1848_v8 = vadd.f32 %v673_v46, %v568_v35  ;;  %v680_v17 = vpop.f32.mrf.mxu0 }
  0xc3   : > { %v450_v37 = vpop.f32.mrf.mxu2 }
  0xc4   : > { %v474_v38 = vadd.f32 %v450_v37, %v373_v3 }
  0xc5   : > { %v380_v39 = vpop.f32.mrf.mxu1 }
  0xc6   : > { %v569_v41 = vadd.f32 %v545_v27, %v474_v38  ;;  %v381_v42 = vadd.f32 %v380_v39, %v1814_v43  ;;  %v550_v30 = vpop.f32.mrf.mxu3 }
  0xc8   : > { %1330 = vmatmul.msk.bf16.gmra.mxu2 %vm289_vm1, %v815_v40  ;;  %v1853_v19 = vadd.f32 %v675_v20, %v569_v41  ;;  %v683_v29 = vpop.f32.mrf.mxu0 }
  0xcb   : > { %v453_v10 = vpop.f32.mrf.mxu2 }
  0xcc   : > { %v475_v44 = vadd.f32 %v453_v10, %v376_v25 }
  0xcd   : > { %v382_v49 = vpop.f32.mrf.mxu1 }
  0xce   : > { %v570_v51 = vadd.f32 %v548_v48, %v475_v44  ;;  %v383_v52 = vadd.f32 %v382_v49, %v1825_v18  ;;  %v553_v53 = vpop.f32.mrf.mxu3 }
  0xd0   : > { %v1856_v54 = vadd.f32 %v678_v0, %v570_v51  ;;  %v685_v55 = vpop.f32.mrf.mxu0 }
  0xd3   : > { %v455_v26 = vpop.f32.mrf.mxu2 }
  0xd4   : > { %v476_v56 = vadd.f32 %v455_v26, %v378_v36 }
  0xd5   : > { %v385_v57 = vpop.f32.mrf.mxu1 }
  0xd6   : > { %v571_v43 = vadd.f32 %v550_v30, %v476_v56  ;;  %v386_v58 = vadd.f32 %v385_v57, %v329_v12  ;;  %v555_v59 = vpop.f32.mrf.mxu3 }
  0xd8   : > { %v1858_v60 = vadd.f32 %v680_v17, %v571_v43  ;;  %v688_v61 = vpop.f32.mrf.mxu0 }
  0xdb   : > { %v458_v14 = vpop.f32.mrf.mxu2 }
  0xdc   : > { %v477_v15 = vadd.f32 %v458_v14, %v381_v42 }
  0xdd   : > { %v387_v45 = vpop.f32.mrf.mxu1 }
  0xde   : > { %v572_v46 = vadd.f32 %v553_v53, %v477_v15  ;;  %v388_v47 = vadd.f32 %v387_v45, %v331_v21  ;;  %v558_v62 = vpop.f32.mrf.mxu3 }
  0xe0   : > { %v1860_v18 = vadd.f32 %v683_v29, %v572_v46  ;;  %v690_v63 = vpop.f32.mrf.mxu0 }
  0xe3   : > { %v460_v2 = vpop.f32.mrf.mxu2 }
  0xe4   : > { %v478_v3 = vadd.f32 %v460_v2, %v383_v52 }
  0xe5   : > { %v390_v4 = vpop.f32.mrf.mxu1 }
  0xe6   : > { %v573_v11 = vadd.f32 %v555_v59, %v478_v3  ;;  %v391_v5 = vadd.f32 %v390_v4, %v1820_v50  ;;  %v560_v12 = vpop.f32.mrf.mxu3 }
  0xe8   : > { %v1863_v6 = vadd.f32 %v685_v55, %v573_v11  ;;  %v693_v7 = vpop.f32.mrf.mxu0 }
  0xeb   : > { %v463_v20 = vpop.f32.mrf.mxu2 }
  0xec   : > { %v479_v1 = vadd.f32 %v463_v20, %v386_v58 }
  0xed   : > { %v392_v22 = vpop.f32.mrf.mxu1 }
  0xee   : > { %v574_v23 = vadd.f32 %v558_v62, %v479_v1  ;;  %v393_v21 = vadd.f32 %v392_v22, %v1829_v13  ;;  %v563_v24 = vpop.f32.mrf.mxu3 }
  0xf0   : > { %v1866_v25 = vadd.f32 %v688_v61, %v574_v23  ;;  %v695_v28 = vpop.f32.mrf.mxu0 }
  0xf3   : > { %v465_v27 = vpop.f32.mrf.mxu2 }
  0xf4   : > { %v480_v31 = vadd.f32 %v465_v27, %v388_v47 }
  0xf5   : > { %v761_v0 = vpop.f32.mrf.mxu1 }
  0xf6   : > { %v575_v16 = vadd.f32 %v560_v12, %v480_v31  ;;  %v565_v32 = vpop.f32.mrf.mxu3  ;;  %v786_v29 = vadd.f32 %v761_v0, %v1848_v8 }
  0xf8   : > { %v1868_v50 = vadd.f32 %v690_v63, %v575_v16  ;;  %v1050_v35 = vpop.f32.mrf.mxu0 }
  0xfb   : > { %v468_v33 = vpop.f32.mrf.mxu2 }
  0xfc   : > { %v481_v34 = vadd.f32 %v468_v33, %v391_v5 }
  0xfd   : > { %v763_v9 = vpop.f32.mrf.mxu1 }
  0xfe   : > { %v576_v36 = vadd.f32 %v563_v24, %v481_v34  ;;  %v962_v48 = vpop.f32.mrf.mxu3  ;;  %v787_v51 = vadd.f32 %v763_v9, %v1853_v19 }
 0x100   : > { %v1870_v17 = vadd.f32 %v693_v7, %v576_v36  ;;  %v1052_v40 = vpop.f32.mrf.mxu0 }
 0x103   : > { %v470_v13 = vpop.f32.mrf.mxu2 }
 0x104   : > { %v482_v37 = vadd.f32 %v470_v13, %v393_v21 }
 0x105   : > { %v766_v42 = vpop.f32.mrf.mxu1 }
 0x106   : > { %v577_v38 = vadd.f32 %v565_v32, %v482_v37  ;;  %v964_v39 = vpop.f32.mrf.mxu3  ;;  %v788_v19 = vadd.f32 %v766_v42, %v1856_v54 }
 0x108   : > { %v1872_v41 = vadd.f32 %v695_v28, %v577_v38  ;;  %v1055_v49 = vpop.f32.mrf.mxu0 }
 0x10b   : > { %v852_v30 = vpop.f32.mrf.mxu2 }
 0x10c   : > { %v877_v10 = vadd.f32 %v852_v30, %v786_v29 }
 0x10d   : > { %v768_v53 = vpop.f32.mrf.mxu1 }
 0x10e   : > { %v967_v44 = vpop.f32.mrf.mxu3  ;;  %v987_v52 = vadd.f32 %v962_v48, %v877_v10  ;;  %v789_v47 = vadd.f32 %v768_v53, %v1858_v60 }
 0x110   : > { %v1075_v56 = vadd.f32 %v1050_v35, %v987_v52  ;;  %v1057_v14 = vpop.f32.mrf.mxu0 }
 0x112   : > { %v1085_v59 = vmax.f32 %v1075_v56, 0.0 }
 0x113   : > { %v854_v55 = vpop.f32.mrf.mxu2 }
 0x114   : > { %v878_v26 = vadd.f32 %v854_v55, %v787_v51 }
 0x115   : > { %v771_v45 = vpop.f32.mrf.mxu1 }
 0x116   : > { %v988_v57 = vadd.f32 %v964_v39, %v878_v26  ;;  %v969_v58 = vpop.f32.mrf.mxu3  ;;  %v790_v54 = vadd.f32 %v771_v45, %v1860_v18 }
 0x118   : > { %v1076_v43 = vadd.f32 %v1052_v40, %v988_v57  ;;  %v1060_v4 = vpop.f32.mrf.mxu0 }
 0x11a   : > { %v1086_v61 = vmax.f32 %v1076_v43, 0.0 }
 0x11b   : > { %v857_v8 = vpop.f32.mrf.mxu2 }
 0x11c   : > { %v1412_v15 = vpack.c.bf16 %v1086_v61, %v1085_v59  ;;  %v879_v46 = vadd.f32 %v857_v8, %v788_v19 }
 0x11d   : > { %v773_v12 = vpop.f32.mrf.mxu1 }
 0x11e   : > { %1413 = vst [vmem:[%s1880_s4] sm:$0xff] %v1412_v15   ;;  %v989_v62 = vadd.f32 %v967_v44, %v879_v46  ;;  %v972_v2 = vpop.f32.mrf.mxu3  ;;  %v791_v28 = vadd.f32 %v773_v12, %v1863_v6 }
 0x120   : > { %v1077_v11 = vadd.f32 %v1055_v49, %v989_v62  ;;  %v1062_v60 = vpop.f32.mrf.mxu0 }
 0x122   : > { %v1087_v20 = vmax.f32 %v1077_v11, 0.0 }
 0x123   : > { %v859_v63 = vpop.f32.mrf.mxu2 }
 0x124   : > { %v880_v3 = vadd.f32 %v859_v63, %v789_v47 }
 0x125   : > { %v776_v27 = vpop.f32.mrf.mxu1 }
 0x126   : > { %v990_v5 = vadd.f32 %v969_v58, %v880_v3  ;;  %v974_v21 = vpop.f32.mrf.mxu3  ;;  %v792_v37 = vadd.f32 %v776_v27, %v1866_v25 }
 0x128   : > { %v1078_v7 = vadd.f32 %v1057_v14, %v990_v5  ;;  %v1065_v36 = vpop.f32.mrf.mxu0 }
 0x12a   : > { %v1088_v1 = vmax.f32 %v1078_v7, 0.0 }
 0x12b   : > { %v862_v22 = vpop.f32.mrf.mxu2 }
 0x12c   : > { %v1417_v23 = vpack.c.bf16 %v1088_v1, %v1087_v20  ;;  %v881_v24 = vadd.f32 %v862_v22, %v790_v54 }
 0x12d   : > { %v778_v18 = vpop.f32.mrf.mxu1 }
 0x12e   : > { %1459 = vst [vmem:[%s1880_s4 + $0x8] sm:$0xff] %v1417_v23   ;;  %v991_v31 = vadd.f32 %v972_v2, %v881_v24  ;;  %v977_v34 = vpop.f32.mrf.mxu3  ;;  %v793_v6 = vadd.f32 %v778_v18, %v1868_v50 }
 0x130   : > { %v1079_v32 = vadd.f32 %v1060_v4, %v991_v31  ;;  %v1067_v30 = vpop.f32.mrf.mxu0 }
 0x132   : > { %v1089_v48 = vmax.f32 %v1079_v32, 0.0 }
 0x133   : > { %v864_v0 = vpop.f32.mrf.mxu2 }
 0x134   : > { %v882_v16 = vadd.f32 %v864_v0, %v791_v28 }
 0x135   : > { %v781_v44 = vpop.f32.mrf.mxu1 }
 0x136   : > { %v992_v33 = vadd.f32 %v974_v21, %v882_v16  ;;  %v979_v40 = vpop.f32.mrf.mxu3  ;;  %v794_v25 = vadd.f32 %v781_v44, %v1870_v17 }
 0x138   : > { %v1080_v35 = vadd.f32 %v1062_v60, %v992_v33  ;;  %v1070_v43 = vpop.f32.mrf.mxu0 }
 0x13a   : > { %v1090_v9 = vmax.f32 %v1080_v35, 0.0 }
 0x13b   : > { %v867_v13 = vpop.f32.mrf.mxu2 }
 0x13c   : > { %v1422_v38 = vpack.c.bf16 %v1090_v9, %v1089_v48  ;;  %v883_v39 = vadd.f32 %v867_v13, %v792_v37 }
 0x13d   : > { %v783_v58 = vpop.f32.mrf.mxu1 }
 0x13e   : > { %1460 = vst [vmem:[%s1880_s4 + $0x10] sm:$0xff] %v1422_v38   ;;  %v993_v42 = vadd.f32 %v977_v34, %v883_v39  ;;  %v982_v26 = vpop.f32.mrf.mxu3  ;;  %v795_v59 = vadd.f32 %v783_v58, %v1872_v41 }
 0x140   : > { %v1081_v49 = vadd.f32 %v1065_v36, %v993_v42  ;;  %v1072_v46 = vpop.f32.mrf.mxu0 }
 0x142   : > { %v1091_v53 = vmax.f32 %v1081_v49, 0.0 }
 0x143   : > { %v869_v29 = vpop.f32.mrf.mxu2 }
 0x144   : > { %v884_v10 = vadd.f32 %v869_v29, %v793_v6 }
 0x146   : > { %v994_v51 = vadd.f32 %v979_v40, %v884_v10  ;;  %v984_v19 = vpop.f32.mrf.mxu3 }
 0x148   : > { %v1082_v52 = vadd.f32 %v1067_v30, %v994_v51 }
 0x14a   : > { %v1092_v55 = vmax.f32 %v1082_v52, 0.0 }
 0x14b   : > { %v872_v56 = vpop.f32.mrf.mxu2 }
 0x14c   : > { %v1427_v57 = vpack.c.bf16 %v1092_v55, %v1091_v53  ;;  %v885_v50 = vadd.f32 %v872_v56, %v794_v25 }
 0x14e   : > { %1461 = vst [vmem:[%s1880_s4 + $0x18] sm:$0xff] %v1427_v57   ;;  %v995_v61 = vadd.f32 %v982_v26, %v885_v50 }
 0x150   : > { %v1083_v15 = vadd.f32 %v1070_v43, %v995_v61 }
 0x152   : > { %v1093_v62 = vmax.f32 %v1083_v15, 0.0 }
 0x153   : > { %v874_v8 = vpop.f32.mrf.mxu2 }
 0x154   : > { %v886_v14 = vadd.f32 %v874_v8, %v795_v59 }
 0x156   : > { %v996_v45 = vadd.f32 %v984_v19, %v886_v14 }
 0x158   : > { %v1084_v47 = vadd.f32 %v1072_v46, %v996_v45 }
 0x15a   : > { %v1094_v63 = vmax.f32 %v1084_v47, 0.0 }
 0x15c   : > { %v1432_v2 = vpack.c.bf16 %v1094_v63, %v1093_v62 }
 0x15e   : > { %1462 = vst [vmem:[%s1880_s4 + $0x20] sm:$0xff] %v1432_v2  }
 0x15f PF: > { %s12_s11 = sadd.s32 1, %s1525_s11   ;;  %s1907_s9 = smov %s1521_s10 }
 0x160   : > { %p9_p5 = scmp.ge.s32.totalorder %s12_s11, 4   ;;  %s1908_s10 = smov %s1910_s12 }
 0x162   :  { %11 = sbr.rel (!%p9_p5) target bundleno = 2 (0x2), region = 69 }

// kernel: down_forward.3
= control target key start
LH: loop header
LB: loop body
LE: loop exit
PB: predicated region body
PF: predicated region fallthrough
CT: control target
= control target key end

     0   :  { %s2179_s9 = smov 0   ;;  %s2181_s10 = smov 0   ;;  %s2681_s0 = inlined_call_operand.vmem [shape: bf16[2,110,128], index: 0, kind: input, shape index: {}]   ;;  %s2682_s1 = inlined_call_operand.vmem [shape: bf16[9,128,128], index: 1, kind: input, shape index: {}]   ;;  %s2683_s2 = inlined_call_operand.vmem [shape: f32[2,80,128], index: 2, kind: output, shape index: {}]  }
   0x1   :  { %s2183_s11 = smov 0  }
   0x2 LB: > { %s24_s12 = sadd.s32 1, %s2158_s10  ;;  %p1548_p0 = scmp.ge.s32.totalorder %s2162_s11, 1  ;;  %s2162_s11 = sphi %s2183_s11, %s12_s11   ;;  %s2158_s10 = sphi %s2181_s10, %s2685_s10   ;;  %s2154_s9 = sphi %s2179_s9, %s2684_s9  }
   0x3   : > { %p26_p1 = scmp.ge.s32.totalorder %s24_s12, 2  ;;  %p135_p2 = scmp.lt.s32.totalorder %s2162_s11, 3 }
   0x5   : > { %s2687_s12 = smov (%p26_p1, %s24_s12), 0  ;;  %p136_p3 = pnand %p1548_p0, %p135_p2 }
   0x6   : > { %p164_p4 = scmp.lt.s32.totalorder (!%p136_p3), %s2154_s9, 1 }
   0x7   : > { %139 = sbr.rel (%p136_p3) target bundleno = 372 (0x174), region = 28 }
   0xc   : > { %v1984_v0 = vld [vmem:[%s2682_s1 + $0x78] sm:$0xff]  ;;  %v1983_v1 = vld [vmem:[%s2682_s1 + $0x70] sm:$0xff]  ;;  %s2689_s9 = smov (!%p164_p4, %s2154_s9), 1  ;;  %v1982_v4 = vld [vmem:[%s2682_s1 + $0x68] sm:$0xff]  ;;  %vm255_vm0 = vsmask.f32 7424 }
   0xd   : > { %353 = vmatpush.bf16.msra.mxu0 %v1984_v0  ;;  %2098 = vmatpush.bf16.msra.mxu1 %v1984_v0  ;;  %v2000_v2 = vld [vmem:[%s2682_s1 + $0xf8] sm:$0xff]  ;;  %v1999_v3 = vld [vmem:[%s2682_s1 + $0xf0] sm:$0xff]  ;;  %s2114_s23 = smul.u32 56, %s2689_s9  ;;  %v1998_v5 = vld [vmem:[%s2682_s1 + $0xe8] sm:$0xff]  ;;  %vm491_vm1 = vcmask 1046528   ;;  %vm918_vm4 = vcmask 1045504  }
   0xe   : > { %2099 = vmatpush.bf16.msra.mxu2 %v1984_v0  ;;  %689 = vmatpush.bf16.msra.mxu3 %v2000_v2  ;;  %v1981_v6 = vld [vmem:[%s2682_s1 + $0x60] sm:$0xff]  ;;  %v1980_v9 = vld [vmem:[%s2682_s1 + $0x58] sm:$0xff]  ;;  %v1979_v15 = vld [vmem:[%s2682_s1 + $0x50] sm:$0xff]  ;;  %vm750_vm2 = vsmask.f32 6400  ;;  %vm1321_vm5 = vcmask 1044480  }
   0xf   : > { %s2224_s30 = scalar_lea.vmem %s2681_s0, %s2114_s23  ;;  %v1997_v7 = vld [vmem:[%s2682_s1 + $0xe0] sm:$0xff]  ;;  %v1996_v14 = vld [vmem:[%s2682_s1 + $0xd8] sm:$0xff]  ;;  %v1995_v22 = vld [vmem:[%s2682_s1 + $0xd0] sm:$0xff]  ;;  %vm1173_vm3 = vsmask.f32 5376 }
  0x10   : > { %v2230_v8 = vld [vmem:[%s2224_s30 + $0x28] sm:$0xff]   ;;  %v2236_v10 = vld [vmem:[%s2224_s30] sm:$0xff]   ;;  %v2239_v11 = vld [vmem:[%s2224_s30 + $0x10] sm:$0xff]  }
  0x11   : > { %354 = vmatpush.bf16.msra.mxu0 %v1983_v1  ;;  %2100 = vmatpush.bf16.msra.mxu1 %v1983_v1  ;;  %v2242_v12 = vunpack.c.l.b16 %v2230_v8  ;;  %v2245_v13 = vld [vmem:[%s2224_s30 + $0x20] sm:$0xff]   ;;  %v2254_v16 = vld [vmem:[%s2224_s30 + $0x8] sm:$0xff]   ;;  %v259_v17 = vshll.u32 %v2236_v10, 16  ;;  %v272_v18 = vshll.u32 %v2239_v11, 16  ;;  %v2259_v19 = vld [vmem:[%s2224_s30 + $0x18] sm:$0xff]   ;;  %v257_v23 = vshrl.u32 %v2236_v10, 16 }
  0x12   : > { %2101 = vmatpush.bf16.msra.mxu2 %v1983_v1  ;;  %690 = vmatpush.bf16.msra.mxu3 %v1999_v3  ;;  %v288_v21 = vshll.u32 %v2245_v13, 16  ;;  %v264_v24 = vshll.u32 %v2254_v16, 16  ;;  %v1978_v25 = vld [vmem:[%s2682_s1 + $0x48] sm:$0xff]  ;;  %v276_v28 = vshrl.u32 %v2239_v11, 16  ;;  %v280_v29 = vshll.u32 %v2259_v19, 16  ;;  %v1977_v34 = vld [vmem:[%s2682_s1 + $0x40] sm:$0xff] }
  0x13   : > { %v2263_v20 = vpack.c.b16 %v2242_v12, %v2242_v12  ;;  %v261_v26 = vrot.slane %v259_v17, 1  ;;  %v2276_v27 = vrot.slane %v272_v18, 1  ;;  %v292_v31 = vshrl.u32 %v2245_v13, 16  ;;  %v1994_v33 = vld [vmem:[%s2682_s1 + $0xc8] sm:$0xff]  ;;  %v1976_v41 = vld [vmem:[%s2682_s1 + $0x38] sm:$0xff]  ;;  %v1993_v48 = vld [vmem:[%s2682_s1 + $0xc0] sm:$0xff] }
  0x14   : > { %v2282_v30 = vrot.slane %v288_v21, 1  ;;  %v266_v36 = vrot.slane %v264_v24, 1  ;;  %v282_v38 = vrot.slane %v280_v29, 1  ;;  %v2300_v39 = vld [vmem:[%s2224_s30 + $0x4] sm:$0xff]   ;;  %v2303_v40 = vld [vmem:[%s2224_s30 + $0xc] sm:$0xff]   ;;  %v1992_v44 = vld [vmem:[%s2682_s1 + $0xb8] sm:$0xff] }
  0x15   : > { %355 = vmatpush.bf16.msra.mxu0 %v1982_v4  ;;  %2102 = vmatpush.bf16.msra.mxu1 %v1982_v4  ;;  %v296_v32 = vshll.u32 %v2263_v20, 16  ;;  %v262_v35 = vor.u32 %v261_v26, %v257_v23  ;;  %v278_v37 = vor.u32 %v276_v28, %v2276_v27  ;;  %v2008_v45 = vld [vmem:[%s2682_s1 + $0x138] sm:$0xff]  ;;  %v625_v49 = vrot.slane %v2300_v39, 1  ;;  %v1975_v52 = vld [vmem:[%s2682_s1 + $0x30] sm:$0xff]  ;;  %v1974_v57 = vld [vmem:[%s2682_s1 + $0x28] sm:$0xff] }
  0x16   : > { %2103 = vmatpush.bf16.msra.mxu2 %v1982_v4  ;;  %691 = vmatpush.bf16.msra.mxu3 %v1998_v5  ;;  %v294_v42 = vor.u32 %v292_v31, %v2282_v30  ;;  %v626_v50 = vrot.slane %v2303_v40, 1  ;;  %v2032_v53 = vld [vmem:[%s2682_s1 + $0x1f8] sm:$0xff]  ;;  %v1991_v54 = vld [vmem:[%s2682_s1 + $0xb0] sm:$0xff]  ;;  %v1990_v59 = vld [vmem:[%s2682_s1 + $0xa8] sm:$0xff]  ;;  %v268_v61 = vshrl.u32 %v2254_v16, 16  ;;  %v284_v62 = vshrl.u32 %v2259_v19, 16 }
  0x17   : > { %v298_v43 = vrot.slane %v296_v32, 1  ;;  %v267_v46 = vsel %vm255_vm0, %v262_v35, %v266_v36  ;;  %v283_v47 = vsel %vm255_vm0, %v278_v37, %v282_v38  ;;  %v2007_v55 = vld [vmem:[%s2682_s1 + $0x130] sm:$0xff]  ;;  %v2006_v60 = vld [vmem:[%s2682_s1 + $0x128] sm:$0xff]  ;;  %v1973_v63 = vld [vmem:[%s2682_s1 + $0x20] sm:$0xff]  ;;  %v763_v32 = vshll.u32 %v2303_v40, 16 }
  0x18   : > { %v627_v56 = vsel %vm491_vm1, %v625_v49, %v626_v50  ;;  %v2031_v58 = vld [vmem:[%s2682_s1 + $0x1f0] sm:$0xff]  ;;  %v1989_v0 = vld [vmem:[%s2682_s1 + $0xa0] sm:$0xff]  ;;  %v270_v2 = vor.u32 %v268_v61, %v266_v36  ;;  %v286_v3 = vor.u32 %v284_v62, %v282_v38  ;;  %v1972_v5 = vld [vmem:[%s2682_s1 + $0x18] sm:$0xff] }
  0x19   : > { %356 = vmatpush.bf16.msra.mxu0 %v1981_v6  ;;  %2104 = vmatpush.bf16.msra.mxu1 %v1981_v6  ;;  %v299_v51 = vsel %vm255_vm0, %v294_v42, %v298_v43  ;;  %v2005_v1 = vld [vmem:[%s2682_s1 + $0x120] sm:$0xff]  ;;  %v2366_v4 = vld [vmem:[%s2224_s30 + $0x14] sm:$0xff]   ;;  %v2030_v26 = vld [vmem:[%s2682_s1 + $0x1e8] sm:$0xff]  ;;  %v765_v42 = vrot.slane %v763_v32, 2 }
  0x1a   : > { %2105 = vmatpush.bf16.msra.mxu2 %v1981_v6  ;;  %692 = vmatpush.bf16.msra.mxu3 %v1997_v7  ;;  %v1988_v6 = vld [vmem:[%s2682_s1 + $0x98] sm:$0xff]  ;;  %v1971_v17 = vld [vmem:[%s2682_s1 + $0x10] sm:$0xff]  ;;  %v1986_v35 = vld [vmem:[%s2682_s1 + $0x88] sm:$0xff] }
  0x1b   : > { %v2004_v7 = vld [vmem:[%s2682_s1 + $0x118] sm:$0xff]  ;;  %v2003_v23 = vld [vmem:[%s2682_s1 + $0x110] sm:$0xff]  ;;  %v2002_v36 = vld [vmem:[%s2682_s1 + $0x108] sm:$0xff] }
  0x1c   : > { %v1969_v43 = vld [vmem:[%s2682_s1] sm:$0xff]  ;;  %v2016_v49 = vld [vmem:[%s2682_s1 + $0x178] sm:$0xff] }
  0x1d   : > { %357 = vmatpush.bf16.msra.mxu0 %v1980_v9  ;;  %2106 = vmatpush.bf16.msra.mxu1 %v1980_v9 }
  0x1e   : > { %2107 = vmatpush.bf16.msra.mxu2 %v1980_v9  ;;  %693 = vmatpush.bf16.msra.mxu3 %v1996_v14  ;;  %v275_v9 = vsel %vm255_vm0, %v270_v2, %v2276_v27  ;;  %v291_v14 = vsel %vm255_vm0, %v286_v3, %v2282_v30  ;;  %v755_v27 = vshll.u32 %v2300_v39, 16  ;;  %v760_v30 = vshrl.u32 %v2303_v40, 16  ;;  %v2014_v2 = vld [vmem:[%s2682_s1 + $0x168] sm:$0xff] }
  0x20   : > { %v757_v38 = vrot.slane %v755_v27, 2  ;;  %v2012_v27 = vld [vmem:[%s2682_s1 + $0x158] sm:$0xff] }
  0x21   : > { %358 = vmatpush.bf16.msra.mxu0 %v1979_v15  ;;  %2108 = vmatpush.bf16.msra.mxu1 %v1979_v15 }
  0x22   : > { %2109 = vmatpush.bf16.msra.mxu2 %v1979_v15  ;;  %694 = vmatpush.bf16.msra.mxu3 %v1995_v22  ;;  %v628_v15 = vrot.slane %v2366_v4, 1  ;;  %v1987_v22 = vld [vmem:[%s2682_s1 + $0x90] sm:$0xff] }
  0x25   : > { %359 = vmatpush.bf16.msra.mxu0 %v1978_v25  ;;  %2110 = vmatpush.bf16.msra.mxu1 %v1978_v25 }
  0x26   : > { %2111 = vmatpush.bf16.msra.mxu2 %v1978_v25  ;;  %695 = vmatpush.bf16.msra.mxu3 %v1994_v33  ;;  %v752_v25 = vshrl.u32 %v2300_v39, 16  ;;  %v629_v33 = vsel %vm491_vm1, %v626_v50, %v628_v15 }
  0x28   : > { %v754_v37 = vrot.slane %v752_v25, 1 }
  0x29   : > { %360 = vmatpush.bf16.msra.mxu0 %v1977_v34  ;;  %2112 = vmatpush.bf16.msra.mxu1 %v1977_v34 }
  0x2a   : > { %2113 = vmatpush.bf16.msra.mxu2 %v1977_v34  ;;  %696 = vmatpush.bf16.msra.mxu3 %v1993_v48  ;;  %v1970_v34 = vld [vmem:[%s2682_s1 + $0x8] sm:$0xff]  ;;  %v2024_v48 = vld [vmem:[%s2682_s1 + $0x1b8] sm:$0xff]  ;;  %v758_v50 = vor.u32 %v757_v38, %v754_v37 }
  0x2c   : > { %361 = vmatmul.bf16.vlgmr.msra.gmra.mxu0 %v267_v46  ;;  %371 = vmatmul.bf16.vlgmr.msra.gmra.mxu1 %v283_v47  ;;  %v493_v46 = vrot.slane %v2254_v16, 1  ;;  %v2001_v47 = vld [vmem:[%s2682_s1 + $0x100] sm:$0xff] }
  0x2d   : > { %440 = vmatpush.bf16.msrb.mxu1 %v1976_v41  ;;  %857 = vmatpush.bf16.msrb.mxu0 %v2008_v45  ;;  %v762_v41 = vrot.slane %v760_v30, 1  ;;  %v492_v45 = vrot.slane %v2236_v10, 1 }
  0x2e   : > { %556 = vmatpush.bf16.msrb.mxu2 %v1992_v44  ;;  %1260 = vmatpush.bf16.msrb.mxu3 %v2032_v53  ;;  %v1985_v44 = vld [vmem:[%s2682_s1 + $0x80] sm:$0xff] }
  0x2f   : > { %381 = vmatmul.bf16.vlgmr.msra.gmra.mxu2 %v299_v51  ;;  %697 = vmatmul.bf16.vlgmr.msra.gmra.mxu3 %v627_v56  ;;  %v766_v51 = vor.u32 %v765_v42, %v762_v41  ;;  %v2431_v53 = vld [vmem:[%s2224_s30 + $0x1c] sm:$0xff]   ;;  %v2023_v56 = vld [vmem:[%s2682_s1 + $0x1b0] sm:$0xff]  ;;  %v2018_v42 = vld [vmem:[%s2682_s1 + $0x188] sm:$0xff] }
  0x30   : > { %v778_v37 = vshrl.u32 %v2431_v53, 16  ;;  %v781_v38 = vshll.u32 %v2431_v53, 16 }
  0x31   : > { %441 = vmatpush.bf16.msrb.mxu1 %v1975_v52  ;;  %858 = vmatpush.bf16.msrb.mxu0 %v2007_v55  ;;  %v2040_v52 = vld [vmem:[%s2682_s1 + $0x238] sm:$0xff]  ;;  %v767_v55 = vsel %vm750_vm2, %v758_v50, %v766_v51 }
  0x32   : > { %557 = vmatpush.bf16.msrb.mxu2 %v1991_v54  ;;  %1261 = vmatpush.bf16.msrb.mxu3 %v2031_v58  ;;  %v494_v54 = vsel %vm491_vm1, %v492_v45, %v493_v46  ;;  %v630_v58 = vrot.slane %v2431_v53, 1  ;;  %v780_v45 = vrot.slane %v778_v37, 1  ;;  %v1049_v37 = vrot.slane %v2239_v11, 2 }
  0x34   : > { %v631_v3 = vsel %vm491_vm1, %v628_v15, %v630_v58  ;;  %v2013_v15 = vld [vmem:[%s2682_s1 + $0x160] sm:$0xff] }
  0x35   : > { %442 = vmatpush.bf16.msrb.mxu1 %v1974_v57  ;;  %859 = vmatpush.bf16.msrb.mxu0 %v2006_v60  ;;  %v2015_v57 = vld [vmem:[%s2682_s1 + $0x170] sm:$0xff]  ;;  %v2029_v60 = vld [vmem:[%s2682_s1 + $0x1e0] sm:$0xff] }
  0x36   : > { %558 = vmatpush.bf16.msrb.mxu2 %v1990_v59  ;;  %1262 = vmatpush.bf16.msrb.mxu3 %v2030_v26  ;;  %v2039_v59 = vld [vmem:[%s2682_s1 + $0x230] sm:$0xff]  ;;  %v2020_v26 = vld [vmem:[%s2682_s1 + $0x198] sm:$0xff] }
  0x39   : > { %443 = vmatpush.bf16.msrb.mxu1 %v1973_v63  ;;  %860 = vmatpush.bf16.msrb.mxu0 %v2005_v1  ;;  %v769_v63 = vshrl.u32 %v2366_v4, 16  ;;  %v2022_v1 = vld [vmem:[%s2682_s1 + $0x1a8] sm:$0xff] }
  0x3a   : > { %559 = vmatpush.bf16.msrb.mxu2 %v1989_v0  ;;  %v772_v0 = vshll.u32 %v2366_v4, 16  ;;  %1263 = vmatpush.bf16.msrb.mxu3 %v2029_v60  ;;  %v2025_v60 = vld [vmem:[%s2682_s1 + $0x1c0] sm:$0xff] }
  0x3c   : > { %366 = vmatmul.bf16.gmra.mxu0 %v275_v9  ;;  %376 = vmatmul.bf16.gmra.mxu1 %v291_v14  ;;  %v774_v9 = vrot.slane %v772_v0, 2  ;;  %v2021_v14 = vld [vmem:[%s2682_s1 + $0x1a0] sm:$0xff] }
  0x3d   : > { %444 = vmatpush.bf16.msrb.mxu1 %v1972_v5  ;;  %861 = vmatpush.bf16.msrb.mxu0 %v2004_v7  ;;  %v2028_v5 = vld [vmem:[%s2682_s1 + $0x1d8] sm:$0xff]  ;;  %v771_v7 = vrot.slane %v769_v63, 1  ;;  %v2009_v0 = vld [vmem:[%s2682_s1 + $0x140] sm:$0xff] }
  0x3e   : > { %560 = vmatpush.bf16.msrb.mxu2 %v1988_v6  ;;  %v2060_v6 = vunpack.c.h.b16 %v2245_v13  ;;  %1264 = vmatpush.bf16.msrb.mxu3 %v2028_v5  ;;  %v1174_v5 = vrot.slane %v268_v61, 2 }
  0x3f   : > { %702 = vmatmul.bf16.gmra.mxu3 %v629_v33  ;;  %v775_v25 = vor.u32 %v774_v9, %v771_v7  ;;  %v2019_v33 = vld [vmem:[%s2682_s1 + $0x190] sm:$0xff]  ;;  %v1177_v7 = vrot.slane %v276_v28, 2  ;;  %v1178_v9 = vrot.slane %v272_v18, 3 }
  0x41   : > { %445 = vmatpush.bf16.msrb.mxu1 %v1971_v17  ;;  %862 = vmatpush.bf16.msrb.mxu0 %v2003_v23  ;;  %v2037_v17 = vld [vmem:[%s2682_s1 + $0x220] sm:$0xff]  ;;  %v2478_v23 = vpack.c.b16 %v2242_v12, %v2060_v6  ;;  %v776_v32 = vsel %vm750_vm2, %v766_v51, %v775_v25  ;;  %v1175_v6 = vrot.slane %v264_v24, 3 }
  0x42   : > { %561 = vmatpush.bf16.msrb.mxu2 %v1987_v22  ;;  %v495_v22 = vrot.slane %v2239_v11, 1 }
  0x43   : > { %v632_v12 = vrot.slane %v2478_v23, 1 }
  0x44   : > { %v496_v30 = vsel %vm491_vm1, %v493_v46, %v495_v22  ;;  %v783_v46 = vrot.slane %v781_v38, 2  ;;  %v1322_v38 = vrot.slane %v2254_v16, 3 }
  0x45   : > { %446 = vmatpush.bf16.msrb.mxu1 %v1970_v34  ;;  %863 = vmatpush.bf16.msrb.mxu0 %v2002_v36  ;;  %v2036_v34 = vld [vmem:[%s2682_s1 + $0x218] sm:$0xff]  ;;  %v2011_v36 = vld [vmem:[%s2682_s1 + $0x150] sm:$0xff]  ;;  %v633_v41 = vsel %vm491_vm1, %v630_v58, %v632_v12  ;;  %v2017_v58 = vld [vmem:[%s2682_s1 + $0x180] sm:$0xff] }
  0x46   : > { %562 = vmatpush.bf16.msrb.mxu2 %v1986_v35  ;;  %v2027_v35 = vld [vmem:[%s2682_s1 + $0x1d0] sm:$0xff] }
  0x47   : > { %1265 = vmatpush.bf16.msrb.mxu3 %v2027_v35 }
  0x49   : > { %447 = vmatpush.bf16.msrb.mxu1 %v1969_v43  ;;  %864 = vmatpush.bf16.msrb.mxu0 %v2001_v47  ;;  %v2035_v43 = vld [vmem:[%s2682_s1 + $0x210] sm:$0xff]  ;;  %v2064_v47 = vunpack.c.h.b16 %v2230_v8 }
  0x4a   : > { %563 = vmatpush.bf16.msrb.mxu2 %v1985_v44  ;;  %v2026_v44 = vld [vmem:[%s2682_s1 + $0x1c8] sm:$0xff] }
  0x4b   : > { %1266 = vmatpush.bf16.msrb.mxu3 %v2026_v44  ;;  %v2516_v50 = vpack.c.b16 %v2064_v47, %v2064_v47  ;;  %v1325_v47 = vrot.slane %v2259_v19, 3 }
  0x4c   : > { %448 = vmatmul.bf16.vlgmr.msrb.gmra.mxu1 %v2236_v10  ;;  %865 = vmatmul.bf16.vlgmr.msrb.gmra.mxu0 %v767_v55  ;;  %v2038_v10 = vld [vmem:[%s2682_s1 + $0x228] sm:$0xff] }
  0x4d   : > { %983 = vmatpush.bf16.msra.mxu1 %v2016_v49  ;;  %1386 = vmatpush.bf16.msra.mxu0 %v2040_v52  ;;  %v784_v49 = vor.u32 %v783_v46, %v780_v45  ;;  %v2010_v55 = vld [vmem:[%s2682_s1 + $0x148] sm:$0xff]  ;;  %v796_v24 = vshrl.u32 %v2516_v50, 16  ;;  %v799_v18 = vshll.u32 %v2516_v50, 16 }
  0x4e   : > { %1112 = vmatpush.bf16.msra.mxu2 %v2024_v48  ;;  %v497_v48 = vrot.slane %v2259_v19, 1 }
  0x4f   : > { %564 = vmatmul.bf16.vlgmr.msrb.gmra.mxu2 %v494_v54  ;;  %707 = vmatmul.bf16.gmra.mxu3 %v631_v3  ;;  %v785_v52 = vsel %vm750_vm2, %v775_v25, %v784_v49  ;;  %v634_v54 = vrot.slane %v2516_v50, 1  ;;  %v499_v3 = vrot.slane %v2245_v13, 1  ;;  %v1179_v25 = vor.u32 %v1178_v9, %v1177_v7 }
  0x50   : > { %v498_v51 = vsel %vm491_vm1, %v495_v22, %v497_v48  ;;  %1267 = vmatpush.bf16.msrb.mxu3 %v2025_v60  ;;  %v1176_v22 = vor.u32 %v1175_v6, %v1174_v5  ;;  %v798_v61 = vrot.slane %v796_v24, 1  ;;  %v1327_v5 = vrot.slane %v2245_v13, 3 }
  0x51   : > { %984 = vmatpush.bf16.msra.mxu1 %v2015_v57  ;;  %1387 = vmatpush.bf16.msra.mxu0 %v2039_v59  ;;  %v790_v57 = vshll.u32 %v2478_v23, 16  ;;  %v2034_v59 = vld [vmem:[%s2682_s1 + $0x208] sm:$0xff]  ;;  %v635_v63 = vsel %vm491_vm1, %v632_v12, %v634_v54  ;;  %v1182_v12 = vrot.slane %v280_v29, 3  ;;  %v920_v29 = vrot.slane %v2303_v40, 2 }
  0x52   : > { %1113 = vmatpush.bf16.msra.mxu2 %v2023_v56  ;;  %v787_v56 = vshrl.u32 %v2478_v23, 16  ;;  %v1180_v28 = vsel %vm1173_vm3, %v1176_v22, %v1179_v25  ;;  %v922_v40 = vrot.slane %v2366_v4, 2  ;;  %v1328_v22 = vsel %vm1321_vm5, %v1325_v47, %v1327_v5 }
  0x55   : > { %985 = vmatpush.bf16.msra.mxu1 %v2014_v2  ;;  %1388 = vmatpush.bf16.msra.mxu0 %v2038_v10  ;;  %v792_v2 = vrot.slane %v790_v57, 2 }
  0x56   : > { %1114 = vmatpush.bf16.msra.mxu2 %v2022_v1  ;;  %v789_v1 = vrot.slane %v787_v56, 1  ;;  %v923_v56 = vsel %vm918_vm4, %v920_v29, %v922_v40 }
  0x58   : > { %v793_v10 = vor.u32 %v792_v2, %v789_v1  ;;  %v1053_v2 = vrot.slane %v2245_v13, 2 }
  0x59   : > { %986 = vmatpush.bf16.msra.mxu1 %v2013_v15  ;;  %1389 = vmatpush.bf16.msra.mxu0 %v2037_v17  ;;  %v2033_v15 = vld [vmem:[%s2682_s1 + $0x200] sm:$0xff] }
  0x5a   : > { %1115 = vmatpush.bf16.msra.mxu2 %v2021_v14  ;;  %v500_v14 = vsel %vm491_vm1, %v497_v48, %v499_v3  ;;  %v794_v17 = vsel %vm750_vm2, %v784_v49, %v793_v10 }
  0x5c   : > { %453 = vmatmul.bf16.gmra.mxu1 %v2254_v16  ;;  %870 = vmatmul.bf16.gmra.mxu0 %v776_v32  ;;  %v1181_v32 = vrot.slane %v284_v62, 2  ;;  %v919_v62 = vrot.slane %v2300_v39, 2 }
  0x5d   : > { %987 = vmatpush.bf16.msra.mxu1 %v2012_v27  ;;  %1390 = vmatpush.bf16.msra.mxu0 %v2036_v34  ;;  %v501_v27 = vrot.slane %v2263_v20, 1  ;;  %v1048_v20 = vrot.slane %v2254_v16, 2  ;;  %v1190_v16 = vshrl.u32 %v2230_v8, 16 }
  0x5e   : > { %1116 = vmatpush.bf16.msra.mxu2 %v2020_v26  ;;  %v801_v26 = vrot.slane %v799_v18, 2  ;;  %v1183_v35 = vor.u32 %v1182_v12, %v1181_v32  ;;  %v921_v45 = vsel %vm918_vm4, %v919_v62, %v920_v29  ;;  %v1329_v32 = vrot.slane %v2230_v8, 3 }
  0x5f   : > { %569 = vmatmul.bf16.gmra.mxu2 %v496_v30  ;;  %712 = vmatmul.bf16.gmra.mxu3 %v633_v41  ;;  %v1323_v41 = vrot.slane %v2239_v11, 3  ;;  %v1050_v44 = vsel %vm918_vm4, %v1048_v20, %v1049_v37  ;;  %v1192_v48 = vrot.slane %v1190_v16, 2 }
  0x60   : > { %v802_v30 = vor.u32 %v801_v26, %v798_v61  ;;  %v1055_v61 = vrot.slane %v2230_v8, 2 }
  0x61   : > { %988 = vmatpush.bf16.msra.mxu1 %v2011_v36  ;;  %1391 = vmatpush.bf16.msra.mxu0 %v2035_v43  ;;  %v1184_v36 = vsel %vm1173_vm3, %v1179_v25, %v1183_v35  ;;  %v1186_v43 = vrot.slane %v288_v21, 3  ;;  %v1324_v39 = vsel %vm1321_vm5, %v1322_v38, %v1323_v41  ;;  %v1051_v21 = vrot.slane %v2259_v19, 2 }
  0x62   : > { %1117 = vmatpush.bf16.msra.mxu2 %v2019_v33  ;;  %v502_v33 = vsel %vm491_vm1, %v499_v3, %v501_v27  ;;  %v803_v34 = vsel %vm750_vm2, %v793_v10, %v802_v30  ;;  %v1326_v57 = vsel %vm1321_vm5, %v1323_v41, %v1325_v47  ;;  %v924_v10 = vrot.slane %v2431_v53, 2 }
  0x63   : > { %v1054_v9 = vsel %vm918_vm4, %v1051_v21, %v1053_v2  ;;  %v926_v30 = vrot.slane %v2478_v23, 2  ;;  %v1056_v12 = vsel %vm918_vm4, %v1053_v2, %v1055_v61 }
  0x65   : > { %989 = vmatpush.bf16.msra.mxu1 %v2010_v55  ;;  %1392 = vmatpush.bf16.msra.mxu0 %v2034_v59 }
  0x66   : > { %1118 = vmatpush.bf16.msra.mxu2 %v2018_v42  ;;  %v1185_v42 = vrot.slane %v292_v31, 2  ;;  %v1193_v31 = vshll.u32 %v2230_v8, 16 }
  0x68   : > { %v1187_v46 = vor.u32 %v1186_v43, %v1185_v42  ;;  %v1195_v49 = vrot.slane %v1193_v31, 3 }
  0x69   : > { %990 = vmatpush.bf16.msra.mxu1 %v2009_v0  ;;  %1393 = vmatpush.bf16.msra.mxu0 %v2033_v15 }
  0x6a   : > { %1119 = vmatpush.bf16.msra.mxu2 %v2017_v58  ;;  %v1196_v58 = vor.u32 %v1195_v49, %v1192_v48 }
  0x6c   : > { %458 = vmatmul.bf16.gmra.mxu1 %v2239_v11  ;;  %875 = vmatmul.bf16.gmra.mxu0 %v785_v52  ;;  %v1188_v11 = vsel %vm1173_vm3, %v1183_v35, %v1187_v46  ;;  %v193_v52 = vld [vmem:[%s2224_s30 + $0x30] sm:$0xf]  ;;  %v1197_v4 = vsel %vm1173_vm3, %v1187_v46, %v1196_v58  ;;  %v927_v35 = vsel %vm918_vm4, %v924_v10, %v926_v30  ;;  %s2115_s30 = smul.u32 80, %s2689_s9 }
  0x6d   : > { %v1045_v59 = vunpack.c.l.b16 %v193_v52 }
  0x6e   : > { %s2652_s24 = scalar_lea.vmem %s2683_s2, %s2115_s30 }
  0x6f   : > { %574 = vmatmul.bf16.gmra.mxu2 %v498_v51  ;;  %717 = vmatmul.bf16.gmra.mxu3 %v635_v63  ;;  %v1052_v51 = vsel %vm918_vm4, %v1049_v37, %v1051_v21 }
  0x7c   : > { %463 = vmatmul.bf16.gmra.mxu1 %v2259_v19  ;;  %880 = vmatmul.bf16.gmra.mxu0 %v794_v17  ;;  %v1047_v19 = vpack.c.b16 %v1045_v59, %v1045_v59  ;;  %v925_v17 = vsel %vm918_vm4, %v922_v40, %v924_v10 }
  0x7e   : > { %v1199_v0 = vshrl.u32 %v1047_v19, 16  ;;  %v1202_v1 = vshll.u32 %v1047_v19, 16  ;;  %v1057_v43 = vrot.slane %v1047_v19, 2  ;;  %v1331_v46 = vrot.slane %v1047_v19, 3 }
  0x7f   : > { %579 = vmatmul.bf16.gmra.mxu2 %v500_v14  ;;  %1268 = vmatmul.bf16.vlgmr.msrb.gmra.mxu3 %v1180_v28 }
  0x80   : > { %v1201_v6 = vrot.slane %v1199_v0, 2  ;;  %v1204_v7 = vrot.slane %v1202_v1, 3  ;;  %v1058_v16 = vsel %vm918_vm4, %v1055_v61, %v1057_v43  ;;  %v1332_v48 = vsel %vm1321_vm5, %v1329_v32, %v1331_v46 }
  0x82   : > { %v1205_v25 = vor.u32 %v1204_v7, %v1201_v6 }
  0x8c   : > { %468 = vmatmul.bf16.gmra.mxu1 %v2245_v13  ;;  %885 = vmatmul.bf16.gmra.mxu0 %v803_v34  ;;  %v1206_v13 = vsel %vm1173_vm3, %v1196_v58, %v1205_v25 }
  0x8f   : > { %584 = vmatmul.bf16.gmra.mxu2 %v502_v33  ;;  %1273 = vmatmul.bf16.gmra.mxu3 %v1184_v36  ;;  %v1330_v36 = vsel %vm1321_vm5, %v1327_v5, %v1329_v32 }
  0x9c   : > { %991 = vmatmul.bf16.vlgmr.msra.gmra.mxu1 %v921_v45  ;;  %1394 = vmatmul.bf16.vlgmr.msra.gmra.mxu0 %v1324_v39  ;;  %v928_v39 = vrot.slane %v2516_v50, 2 }
  0x9e   : > { %v929_v47 = vsel %vm918_vm4, %v926_v30, %v928_v39 }
  0x9f   : > { %1120 = vmatmul.bf16.vlgmr.msra.gmra.mxu2 %v1050_v44  ;;  %1278 = vmatmul.bf16.gmra.mxu3 %v1188_v11 }
  0xa9   : > { %v362_v54 = vpop.f32.mrf.mxu0  ;;  %v2588_v55 = vpop.f32.mrf.mxu1 }
  0xac   : > { %996 = vmatmul.bf16.gmra.mxu1 %v923_v56  ;;  %1399 = vmatmul.bf16.gmra.mxu0 %v1326_v57 }
  0xaf   : > { %1125 = vmatmul.bf16.gmra.mxu2 %v1052_v51  ;;  %1283 = vmatmul.bf16.gmra.mxu3 %v1197_v4 }
  0xb1   : > { %v364_v60 = vpop.f32.mrf.mxu0  ;;  %v2593_v63 = vpop.f32.mrf.mxu1 }
  0xb2   : > { %v698_v3 = vpop.f32.mrf.mxu3  ;;  %v2603_v24 = vpop.f32.mrf.mxu2 }
  0xb9   : > { %v367_v14 = vpop.f32.mrf.mxu0  ;;  %v2599_v15 = vpop.f32.mrf.mxu1 }
  0xba   : > { %v700_v18 = vpop.f32.mrf.mxu3  ;;  %v2609_v27 = vpop.f32.mrf.mxu2 }
  0xbc   : > { %1001 = vmatmul.bf16.gmra.mxu1 %v925_v17  ;;  %1404 = vmatmul.bf16.gmra.mxu0 %v1328_v22 }
  0xbf   : > { %1130 = vmatmul.bf16.gmra.mxu2 %v1054_v9  ;;  %1288 = vmatmul.bf16.gmra.mxu3 %v1206_v13 }
  0xc1   : > { %v369_v53 = vpop.f32.mrf.mxu0  ;;  %v2606_v28 = vpop.f32.mrf.mxu1 }
  0xc2   : > { %v703_v26 = vpop.f32.mrf.mxu3 }
  0xc9   : > { %v449_v33 = vpop.f32.mrf.mxu1  ;;  %v866_v34 = vpop.f32.mrf.mxu0 }
  0xca   : > { %v450_v20 = vadd.f32 %v449_v33, %v362_v54  ;;  %v705_v37 = vpop.f32.mrf.mxu3 }
  0xcc   : > { %1006 = vmatmul.bf16.gmra.mxu1 %v927_v35  ;;  %1409 = vmatmul.bf16.gmra.mxu0 %v1330_v36 }
  0xcf   : > { %1135 = vmatmul.bf16.gmra.mxu2 %v1056_v12 }
  0xd1   : > { %v451_v41 = vpop.f32.mrf.mxu1  ;;  %v868_v23 = vpop.f32.mrf.mxu0 }
  0xd2   : > { %v565_v62 = vpop.f32.mrf.mxu2  ;;  %v452_v42 = vadd.f32 %v451_v41, %v364_v60  ;;  %v708_v44 = vpop.f32.mrf.mxu3 }
  0xd3   : > { %v590_v29 = vadd.f32 %v565_v62, %v450_v20 }
  0xd5   : > { %v723_v38 = vadd.f32 %v698_v3, %v590_v29 }
  0xd7   : > { %v2616_v8 = vadd.f32 %v866_v34, %v723_v38 }
  0xd9   : > { %v454_v21 = vpop.f32.mrf.mxu1  ;;  %v871_v40 = vpop.f32.mrf.mxu0 }
  0xda   : > { %v567_v45 = vpop.f32.mrf.mxu2  ;;  %v455_v49 = vadd.f32 %v454_v21, %v367_v14  ;;  %v710_v52 = vpop.f32.mrf.mxu3 }
  0xdb   : > { %v591_v11 = vadd.f32 %v567_v45, %v452_v42 }
  0xdc   : > { %1011 = vmatmul.bf16.gmra.mxu1 %v929_v47  ;;  %1414 = vmatmul.bf16.gmra.mxu0 %v1332_v48 }
  0xdd   : > { %v724_v31 = vadd.f32 %v700_v18, %v591_v11 }
  0xdf   : > { %1140 = vmatmul.bf16.gmra.mxu2 %v1058_v16  ;;  %v2622_v51 = vadd.f32 %v868_v23, %v724_v31 }
  0xe1   : > { %v456_v57 = vpop.f32.mrf.mxu1  ;;  %v873_v58 = vpop.f32.mrf.mxu0 }
  0xe2   : > { %v570_v54 = vpop.f32.mrf.mxu2  ;;  %v457_v59 = vadd.f32 %v456_v57, %v369_v53  ;;  %v713_v19 = vpop.f32.mrf.mxu3 }
  0xe3   : > { %v592_v50 = vadd.f32 %v570_v54, %v455_v49 }
  0xe5   : > { %v725_v56 = vadd.f32 %v703_v26, %v592_v50 }
  0xe7   : > { %v2624_v4 = vadd.f32 %v871_v40, %v725_v56 }
  0xe9   : > { %v459_v2 = vpop.f32.mrf.mxu1  ;;  %v876_v3 = vpop.f32.mrf.mxu0 }
  0xea   : > { %v572_v60 = vpop.f32.mrf.mxu2  ;;  %v460_v10 = vadd.f32 %v459_v2, %v2588_v55  ;;  %v715_v9 = vpop.f32.mrf.mxu3 }
  0xeb   : > { %v593_v0 = vadd.f32 %v572_v60, %v457_v59 }
  0xed   : > { %v726_v1 = vadd.f32 %v705_v37, %v593_v0 }
  0xef   : > { %v2627_v5 = vadd.f32 %v873_v58, %v726_v1 }
  0xf1   : > { %v461_v17 = vpop.f32.mrf.mxu1  ;;  %v878_v22 = vpop.f32.mrf.mxu0 }
  0xf2   : > { %v575_v6 = vpop.f32.mrf.mxu2  ;;  %v462_v25 = vadd.f32 %v461_v17, %v2593_v63  ;;  %v718_v26 = vpop.f32.mrf.mxu3 }
  0xf3   : > { %v594_v7 = vadd.f32 %v575_v6, %v460_v10 }
  0xf5   : > { %v727_v14 = vadd.f32 %v708_v44, %v594_v7 }
  0xf7   : > { %v2630_v18 = vadd.f32 %v876_v3, %v727_v14 }
  0xf9   : > { %v464_v30 = vpop.f32.mrf.mxu1  ;;  %v881_v32 = vpop.f32.mrf.mxu0 }
  0xfa   : > { %v577_v13 = vpop.f32.mrf.mxu2  ;;  %v465_v55 = vadd.f32 %v464_v30, %v2599_v15  ;;  %v720_v63 = vpop.f32.mrf.mxu3 }
  0xfb   : > { %v595_v53 = vadd.f32 %v577_v13, %v462_v25 }
  0xfd   : > { %v728_v61 = vadd.f32 %v710_v52, %v595_v53 }
  0xff   : > { %v2633_v12 = vadd.f32 %v878_v22, %v728_v61 }
 0x101   : > { %v466_v36 = vpop.f32.mrf.mxu1  ;;  %v883_v20 = vpop.f32.mrf.mxu0 }
 0x102   : > { %v580_v33 = vpop.f32.mrf.mxu2  ;;  %v467_v37 = vadd.f32 %v466_v36, %v2606_v28  ;;  %v1269_v44 = vpop.f32.mrf.mxu3 }
 0x103   : > { %v596_v34 = vadd.f32 %v580_v33, %v465_v55 }
 0x105   : > { %v729_v35 = vadd.f32 %v713_v19, %v596_v34 }
 0x107   : > { %v2636_v62 = vadd.f32 %v881_v32, %v729_v35 }
 0x109   : > { %v469_v23 = vpop.f32.mrf.mxu1  ;;  %v886_v42 = vpop.f32.mrf.mxu0 }
 0x10a   : > { %v582_v29 = vpop.f32.mrf.mxu2  ;;  %v470_v43 = vadd.f32 %v469_v23, %v2603_v24  ;;  %v1271_v47 = vpop.f32.mrf.mxu3 }
 0x10b   : > { %v597_v38 = vadd.f32 %v582_v29, %v467_v37 }
 0x10d   : > { %v730_v41 = vadd.f32 %v715_v9, %v597_v38 }
 0x10f   : > { %v2639_v15 = vadd.f32 %v883_v20, %v730_v41 }
 0x111   : > { %v471_v11 = vpop.f32.mrf.mxu1  ;;  %v888_v16 = vpop.f32.mrf.mxu0 }
 0x112   : > { %v585_v45 = vpop.f32.mrf.mxu2  ;;  %v472_v28 = vadd.f32 %v471_v11, %v2609_v27  ;;  %v1274_v58 = vpop.f32.mrf.mxu3 }
 0x113   : > { %v598_v39 = vadd.f32 %v585_v45, %v470_v43 }
 0x115   : > { %v731_v46 = vadd.f32 %v718_v26, %v598_v39 }
 0x117   : > { %v2642_v31 = vadd.f32 %v886_v42, %v731_v46 }
 0x119   : > { %v992_v49 = vpop.f32.mrf.mxu1  ;;  %v1395_v52 = vpop.f32.mrf.mxu0 }
 0x11a   : > { %v587_v21 = vpop.f32.mrf.mxu2  ;;  %v1017_v24 = vadd.f32 %v992_v49, %v2616_v8  ;;  %v1276_v9 = vpop.f32.mrf.mxu3 }
 0x11b   : > { %v599_v40 = vadd.f32 %v587_v21, %v472_v28 }
 0x11d   : > { %v732_v48 = vadd.f32 %v720_v63, %v599_v40 }
 0x11f   : > { %v2645_v54 = vadd.f32 %v888_v16, %v732_v48 }
 0x121   : > { %v994_v59 = vpop.f32.mrf.mxu1  ;;  %v1397_v19 = vpop.f32.mrf.mxu0 }
 0x122   : > { %v1121_v50 = vpop.f32.mrf.mxu2  ;;  %v1018_v60 = vadd.f32 %v994_v59, %v2622_v51  ;;  %v1279_v32 = vpop.f32.mrf.mxu3 }
 0x123   : > { %v1146_v56 = vadd.f32 %v1121_v50, %v1017_v24 }
 0x125   : > { %v1294_v57 = vadd.f32 %v1269_v44, %v1146_v56 }
 0x127   : > { %v1420_v27 = vadd.f32 %v1395_v52, %v1294_v57 }
 0x129   : > { %v1430_v8 = vmax.f32 %v1420_v27, 0.0  ;;  %v997_v3 = vpop.f32.mrf.mxu1  ;;  %v1400_v10 = vpop.f32.mrf.mxu0 }
 0x12a   : > { %v1123_v0 = vpop.f32.mrf.mxu2  ;;  %v1019_v7 = vadd.f32 %v997_v3, %v2624_v4  ;;  %v1281_v29 = vpop.f32.mrf.mxu3 }
 0x12b   : > { %1440 = vst [vmem:[%s2652_s24] sm:$0xff] %v1430_v8  ;;  %v1147_v1 = vadd.f32 %v1123_v0, %v1018_v60 }
 0x12d   : > { %v1295_v2 = vadd.f32 %v1271_v47, %v1147_v1 }
 0x12f   : > { %v1421_v6 = vadd.f32 %v1397_v19, %v1295_v2 }
 0x131   : > { %v1431_v51 = vmax.f32 %v1421_v6, 0.0  ;;  %v999_v25 = vpop.f32.mrf.mxu1  ;;  %v1402_v13 = vpop.f32.mrf.mxu0 }
 0x132   : > { %v1126_v14 = vpop.f32.mrf.mxu2  ;;  %v1020_v61 = vadd.f32 %v999_v25, %v2627_v5  ;;  %v1284_v46 = vpop.f32.mrf.mxu3 }
 0x133   : > { %1441 = vst [vmem:[%s2652_s24 + $0x8] sm:$0xff] %v1431_v51  ;;  %v1148_v17 = vadd.f32 %v1126_v14, %v1019_v7 }
 0x135   : > { %v1296_v22 = vadd.f32 %v1274_v58, %v1148_v17 }
 0x137   : > { %v1422_v53 = vadd.f32 %v1400_v10, %v1296_v22 }
 0x139   : > { %v1432_v26 = vmax.f32 %v1422_v53, 0.0  ;;  %v1002_v34 = vpop.f32.mrf.mxu1  ;;  %v1405_v4 = vpop.f32.mrf.mxu0 }
 0x13a   : > { %v1128_v30 = vpop.f32.mrf.mxu2  ;;  %v1021_v36 = vadd.f32 %v1002_v34, %v2630_v18  ;;  %v1286_v24 = vpop.f32.mrf.mxu3 }
 0x13b   : > { %1442 = vst [vmem:[%s2652_s24 + $0x10] sm:$0xff] %v1432_v26  ;;  %v1149_v55 = vadd.f32 %v1128_v30, %v1020_v61 }
 0x13d   : > { %v1297_v33 = vadd.f32 %v1276_v9, %v1149_v55 }
 0x13f   : > { %v1423_v35 = vadd.f32 %v1402_v13, %v1297_v33 }
 0x141   : > { %v1433_v20 = vmax.f32 %v1423_v35, 0.0  ;;  %v1004_v41 = vpop.f32.mrf.mxu1  ;;  %v1407_v5 = vpop.f32.mrf.mxu0 }
 0x142   : > { %v1131_v37 = vpop.f32.mrf.mxu2  ;;  %v1022_v42 = vadd.f32 %v1004_v41, %v2633_v12  ;;  %v1289_v8 = vpop.f32.mrf.mxu3 }
 0x143   : > { %1443 = vst [vmem:[%s2652_s24 + $0x18] sm:$0xff] %v1433_v20  ;;  %v1150_v63 = vadd.f32 %v1131_v37, %v1021_v36 }
 0x145   : > { %v1298_v38 = vadd.f32 %v1279_v32, %v1150_v63 }
 0x147   : > { %v1424_v23 = vadd.f32 %v1405_v4, %v1298_v38 }
 0x149   : > { %v1434_v43 = vmax.f32 %v1424_v23, 0.0  ;;  %v1007_v11 = vpop.f32.mrf.mxu1  ;;  %v1410_v28 = vpop.f32.mrf.mxu0 }
 0x14a   : > { %v1133_v44 = vpop.f32.mrf.mxu2  ;;  %v1023_v16 = vadd.f32 %v1007_v11, %v2636_v62  ;;  %v1291_v14 = vpop.f32.mrf.mxu3 }
 0x14b   : > { %1444 = vst [vmem:[%s2652_s24 + $0x20] sm:$0xff] %v1434_v43  ;;  %v1151_v45 = vadd.f32 %v1133_v44, %v1022_v42 }
 0x14d   : > { %v1299_v39 = vadd.f32 %v1281_v29, %v1151_v45 }
 0x14f   : > { %v1425_v18 = vadd.f32 %v1407_v5, %v1299_v39 }
 0x151   : > { %v1435_v21 = vmax.f32 %v1425_v18, 0.0  ;;  %v1009_v49 = vpop.f32.mrf.mxu1  ;;  %v1412_v56 = vpop.f32.mrf.mxu0 }
 0x152   : > { %v1136_v40 = vpop.f32.mrf.mxu2  ;;  %v1024_v52 = vadd.f32 %v1009_v49, %v2639_v15 }
 0x153   : > { %1445 = vst [vmem:[%s2652_s24 + $0x28] sm:$0xff] %v1435_v21  ;;  %v1152_v47 = vadd.f32 %v1136_v40, %v1023_v16 }
 0x155   : > { %v1300_v48 = vadd.f32 %v1284_v46, %v1152_v47 }
 0x157   : > { %v1426_v12 = vadd.f32 %v1410_v28, %v1300_v48 }
 0x159   : > { %v1436_v50 = vmax.f32 %v1426_v12, 0.0  ;;  %v1012_v62 = vpop.f32.mrf.mxu1  ;;  %v1415_v2 = vpop.f32.mrf.mxu0 }
 0x15a   : > { %v1138_v57 = vpop.f32.mrf.mxu2  ;;  %v1025_v27 = vadd.f32 %v1012_v62, %v2642_v31 }
 0x15b   : > { %1446 = vst [vmem:[%s2652_s24 + $0x30] sm:$0xff] %v1436_v50  ;;  %v1153_v58 = vadd.f32 %v1138_v57, %v1024_v52 }
 0x15d   : > { %v1301_v59 = vadd.f32 %v1286_v24, %v1153_v58 }
 0x15f   : > { %v1427_v19 = vadd.f32 %v1412_v56, %v1301_v59 }
 0x161   : > { %v1437_v60 = vmax.f32 %v1427_v19, 0.0  ;;  %v1014_v3 = vpop.f32.mrf.mxu1  ;;  %v1417_v22 = vpop.f32.mrf.mxu0 }
 0x162   : > { %v1141_v0 = vpop.f32.mrf.mxu2  ;;  %v1026_v6 = vadd.f32 %v1014_v3, %v2645_v54 }
 0x163   : > { %1447 = vst [vmem:[%s2652_s24 + $0x38] sm:$0xff] %v1437_v60  ;;  %v1154_v1 = vadd.f32 %v1141_v0, %v1025_v27 }
 0x165   : > { %v1302_v15 = vadd.f32 %v1289_v8, %v1154_v1 }
 0x167   : > { %v1428_v10 = vadd.f32 %v1415_v2, %v1302_v15 }
 0x169   : > { %v1438_v7 = vmax.f32 %v1428_v10, 0.0 }
 0x16a   : > { %v1143_v9 = vpop.f32.mrf.mxu2 }
 0x16b   : > { %1448 = vst [vmem:[%s2652_s24 + $0x40] sm:$0xff] %v1438_v7  ;;  %v1155_v51 = vadd.f32 %v1143_v9, %v1026_v6 }
 0x16d   : > { %v1303_v17 = vadd.f32 %v1291_v14, %v1155_v51 }
 0x16f   : > { %v1429_v31 = vadd.f32 %v1417_v22, %v1303_v17 }
 0x171   : > { %v1439_v25 = vmax.f32 %v1429_v31, 0.0 }
 0x173   : > { %1449 = vst [vmem:[%s2652_s24 + $0x48] sm:$0xff] %v1439_v25 }
 0x174 PF: > { %s12_s11 = sadd.s32 1, %s2162_s11   ;;  %s2684_s9 = smov %s2158_s10 }
 0x175   : > { %p9_p5 = scmp.ge.s32.totalorder %s12_s11, 4   ;;  %s2685_s10 = smov %s2687_s12 }
 0x177   :  { %11 = sbr.rel (!%p9_p5) target bundleno = 2 (0x2), region = 69 }

</bundles_post_ra>
